<compile_context>
chip_gen: v7x
topology: tpu7x:2x2x1
jax: 0.10.0
libtpu: 0.0.40
codegen_flags: <defaults>
</compile_context>

<pallas_src>
import functools

import numpy as np
import jax
import jax.numpy as jnp
from jax import lax
from jax.experimental import pallas as pl
from jax.experimental.pallas import tpu as pltpu

_LANE = 128
_SUBLANE = 8
# Vocabularies at or below this use the dense (one-hot, strip-mined) path;
# larger vocabularies use the index-gather path.
_DENSE_VOCAB_MAX = 2048


def _round_up(x: int, m: int) -> int:
    return ((x + m - 1) // m) * m


def _vmem_block_bytes(rows: int, cols: int, itemsize: int = 4) -> int:
    """VMEM footprint of one (rows, cols) f32 buffer after (8, 128) padding."""
    return _round_up(max(rows, 1), _SUBLANE) * _round_up(max(cols, 1), _LANE) * itemsize


# ----------------------------------------------------------------------------
# Kernels
# ----------------------------------------------------------------------------
def _dense_d1_kernel(idx_ref, table_ref, out_ref):
    """Small-vocab, output_dim == 1: mask-select + lane reduce per 128-lane strip.

    idx_ref:   (TB, F)  int32 VMEM  (offsets already folded in)
    table_ref: (1, Vp)  f32   VMEM  (whole lane-dense table, fetched once)
    out_ref:   (TB, 1)  f32   VMEM
    """
    tb, num_fields = idx_ref.shape
    vp = table_ref.shape[1]
    lanes = lax.broadcasted_iota(jnp.int32, (tb, _LANE), 1)
    acc = jnp.zeros((tb, 1), jnp.float32)
    for s in range(vp // _LANE):          # small static vocab -> unrolled strips
        base = s * _LANE
        row = table_ref[:, base:base + _LANE]                 # (1, 128)
        strip = jnp.zeros((tb, _LANE), jnp.float32)
        for f in range(num_fields):                           # F tiny & static
            hit = lanes == (idx_ref[:, f:f + 1] - base)
            strip = strip + jnp.where(hit, row, 0.0)
        acc = acc + jnp.sum(strip, axis=1, keepdims=True)     # XLU lane reduce
    out_ref[...] = acc


def _dense_mxu_kernel(idx_ref, table_ref, out_ref):
    """Small-vocab, output_dim > 1: per-strip hit-count matrix @ table strip.

    idx_ref:   (TB, F)  int32 VMEM
    table_ref: (Vp, D)  f32   VMEM  (whole table, fetched once)
    out_ref:   (TB, D)  f32   VMEM
    """
    tb, num_fields = idx_ref.shape
    vp, _ = table_ref.shape
    lanes = lax.broadcasted_iota(jnp.int32, (tb, _LANE), 1)
    acc = jnp.zeros(out_ref.shape, jnp.float32)
    for s in range(vp // _LANE):
        base = s * _LANE
        counts = jnp.zeros((tb, _LANE), jnp.float32)
        for f in range(num_fields):
            counts = counts + (lanes == (idx_ref[:, f:f + 1] - base)).astype(jnp.float32)
        # NOTE: counts are exact small integers; a bf16 counts/table dot would be
        # ~4x faster on the MXU, but the matmul is not the binding slot at small D.
        acc = acc + jnp.dot(counts, table_ref[base:base + _LANE, :],
                            preferred_element_type=jnp.float32)
    out_ref[...] = acc


def _gather_kernel(idx_ref, table_ref, out_ref, *, num_fields):
    """Large-vocab path: per-row gather-and-sum of embedding rows.

    idx_ref:   (Bp*F,) int32 SMEM  (scalar-prefetched, offsets folded in)
    table_ref: (V, D)  f32   VMEM  (whole table, fetched from HBM exactly once)
    out_ref:   (TB, D) f32   VMEM
    """
    tb = out_ref.shape[0]
    base = pl.program_id(0) * (tb * num_fields)

    def row_body(r, carry):
        off = base + r * num_fields
        row = table_ref[pl.ds(idx_ref[off], 1), :]
        for f in range(1, num_fields):                 # F tiny & static -> unrolled
            row = row + table_ref[pl.ds(idx_ref[off + f], 1), :]
        out_ref[pl.ds(r, 1), :] = row
        return carry

    # Plain fori_loop for maximum lowering compatibility; a modest unroll
    # would further amortize per-row loop overhead.
    lax.fori_loop(0, tb, row_body, 0)


# ----------------------------------------------------------------------------
# Wrapper
# ----------------------------------------------------------------------------
def features_linear(x_idx, offsets, table, bias, *, tb=128):
    """FeaturesLinear forward: sum_f table[x + offsets][:, f, :] + bias.

    x_idx:   (B, F) integer per-field indices
    offsets: (F,)   int32 exclusive cumsum of field_dims
    table:   (V, D) float32 embedding table, V = sum(field_dims)
    bias:    (D,)   float32
    returns  (B, D) float32
    """
    B, F = x_idx.shape
    V, D = table.shape
    table = table.astype(jnp.float32)

    # Fold the offsets add into the wrapper (one cheap XLA add).
    shifted = x_idx.astype(jnp.int32) + offsets.astype(jnp.int32)[None, :]

    # Batch tiling: rows in multiples of 8; keep >= 2 batch tiles whenever
    # possible so ("parallel",) can shard across v7x's two TensorCores.
    tb_ = max(_SUBLANE, min(_round_up(tb, _SUBLANE), _round_up(B, _SUBLANE)))
    Bp = _round_up(B, tb_)
    if Bp // tb_ < 2 and B > _SUBLANE:
        tb_ = _round_up((Bp + 1) // 2, _SUBLANE)
        Bp = _round_up(B, tb_)
    nb = Bp // tb_
    if Bp != B:
        shifted = jnp.pad(shifted, ((0, Bp - B), (0, 0)))   # padded rows hit row 0

    use_gather = V > _DENSE_VOCAB_MAX

    if use_gather:
        # ---- index-gather path --------------------------------------------
        table_vmem = 2 * _vmem_block_bytes(V, D)            # double-buffered block
        if table_vmem > 48 * 1024 * 1024:
            # TODO(synk): HBM-resident table (memory_space=pl.ANY) + manual per-row
            # pltpu.make_async_copy gather once the table no longer fits in VMEM.
            raise NotImplementedError("embedding table does not fit in VMEM")
        idx_flat = shifted.reshape(-1)                       # (Bp*F,) int32 -> SMEM
        grid_spec = pltpu.PrefetchScalarGridSpec(
            num_scalar_prefetch=1,
            grid=(nb,),
            in_specs=[pl.BlockSpec((V, D), lambda b, idx: (0, 0))],
            out_specs=pl.BlockSpec((tb_, D), lambda b, idx: (b, 0)),
        )
        kernel = functools.partial(_gather_kernel, num_fields=F)
        operands = (idx_flat, table)
        cost = pl.CostEstimate(flops=Bp * F * D, transcendentals=0,
                               bytes_accessed=V * D * 4 + Bp * F * 4 + Bp * D * 4)
    else:
        # ---- dense (one-hot) path for small vocabularies -------------------
        Vp = _round_up(V, _LANE)
        table_p = jnp.pad(table, ((0, Vp - V), (0, 0))) if Vp != V else table
        if D == 1:
            # Lane-dense (1, Vp) view for the VPU/XLU path.  V <= _DENSE_VOCAB_MAX
            # here, so this relayout moves at most a few KiB.
            table_arg = table_p.reshape(1, Vp)
            table_spec = pl.BlockSpec((1, Vp), lambda b: (0, 0))
            kernel = _dense_d1_kernel
        else:
            table_arg = table_p
            table_spec = pl.BlockSpec((Vp, D), lambda b: (0, 0))
            kernel = _dense_mxu_kernel
        table_vmem = 2 * _vmem_block_bytes(*table_arg.shape)
        grid_spec = pltpu.PrefetchScalarGridSpec(
            num_scalar_prefetch=0,
            grid=(nb,),
            in_specs=[pl.BlockSpec((tb_, F), lambda b: (b, 0)), table_spec],
            out_specs=pl.BlockSpec((tb_, D), lambda b: (b, 0)),
        )
        operands = (shifted, table_arg)
        cost = pl.CostEstimate(flops=2 * Bp * Vp * D + Bp * Vp * F,
                               transcendentals=0,
                               bytes_accessed=Vp * D * 4 + Bp * F * 4 + Bp * D * 4)

    vmem_limit = int(min(56 * 1024 * 1024,
                         max(24 * 1024 * 1024, table_vmem + 8 * 1024 * 1024)))

    out_p = pl.pallas_call(
        kernel,
        out_shape=jax.ShapeDtypeStruct((Bp, D), jnp.float32),
        grid_spec=grid_spec,
        compiler_params=pltpu.CompilerParams(
            dimension_semantics=("parallel",),
            vmem_limit_bytes=vmem_limit),
        cost_estimate=cost,
    )(*operands)

    # Bias folded outside the kernel (drops a VMEM operand and its DMA).
    return out_p[:B] + bias.astype(jnp.float32)[None, :]


# ----------------------------------------------------------------------------
# Self-test
# ----------------------------------------------------------------------------
def _reference(x_idx, offsets, table, bias):
    shifted = x_idx + offsets[None, :]
    return jnp.sum(table[shifted], axis=1) + bias[None, :]


def _make_case(key, field_dims, batch, output_dim):
    field_dims = np.asarray(field_dims, dtype=np.int32)
    vocab = int(field_dims.sum())
    offsets = jnp.asarray(np.array((0, *np.cumsum(field_dims)[:-1]), dtype=np.int32))
    k_t, k_b, k_x = jax.random.split(key, 3)
    table = jax.random.normal(k_t, (vocab, output_dim), dtype=jnp.float32)
    bias = jax.random.normal(k_b, (output_dim,), dtype=jnp.float32)
    xkeys = jax.random.split(k_x, len(field_dims))
    cols = [jax.random.randint(xkeys[f], (batch,), 0, int(field_dims[f]),
                               dtype=jnp.int32) for f in range(len(field_dims))]
    x_idx = jnp.stack(cols, axis=1)
    return x_idx, offsets, table, bias


if __name__ == "__main__":
    root = jax.random.PRNGKey(0)
    keys = jax.random.split(root, 4)
    batch = 256

    cases = [
        ([50, 100, 150, 37], 1),       # small vocab -> dense D=1 (module default)
        ([50, 100, 150, 37], 8),       # small vocab -> dense MXU path
        ([1200, 1000, 950, 850], 1),   # large vocab -> gather path, D=1
        ([1200, 1000, 950, 850], 16),  # large vocab -> gather path, D>1
    ]
    for key, (field_dims, output_dim) in zip(keys, cases):
        x_idx, offsets, table, bias = _make_case(key, field_dims, batch, output_dim)
        out = jax.block_until_ready(features_linear(x_idx, offsets, table, bias))
        ref = _reference(x_idx, offsets, table, bias)
        assert out.shape == (batch, output_dim)
        np.testing.assert_allclose(np.asarray(out), np.asarray(ref),
                                   rtol=1e-5, atol=1e-5)

    print("KERNEL_OK")
</pallas_src>

<mosaic_0001>
module attributes {stable_mosaic.version = 11 : i64} {
  func.func @_dense_d1_kernel(%arg0: i32, %arg1: memref<128x4xi32, #tpu.memory_space<vmem>>, %arg2: memref<1x384xf32, #tpu.memory_space<vmem>>, %arg3: memref<128x1xf32, #tpu.memory_space<vmem>>) attributes {dimension_semantics = [#tpu.dimension_semantics<parallel>], iteration_bounds = array<i64: 2>, scalar_prefetch = 0 : i64, scratch_operands = 0 : i64, tpu.core_type = #tpu.core_type<tc>, window_params = [{transform_indices = @transform_0, window_bounds = array<i64: 128, 4>}, {pipeline_mode = #tpu.pipeline_mode<synchronous>, transform_indices = @transform_1, window_bounds = array<i64: 1, 384>}, {transform_indices = @transform_2, window_bounds = array<i64: 128, 1>}]} {
    %0 = tpu.iota {dimensions = array<i32: 1>} : vector<128x128xi32>
    %cst = arith.constant 0.000000e+00 : f32
    %1 = vector.broadcast %cst : f32 to vector<128x1xf32>
    %c0 = arith.constant 0 : index
    %c0_0 = arith.constant 0 : index
    %2 = vector.load %arg2[%c0, %c0_0] : memref<1x384xf32, #tpu.memory_space<vmem>>, vector<1x128xf32>
    %cst_1 = arith.constant 0.000000e+00 : f32
    %3 = vector.broadcast %cst_1 : f32 to vector<128x128xf32>
    %c0_2 = arith.constant 0 : index
    %c0_3 = arith.constant 0 : index
    %4 = vector.load %arg1[%c0_2, %c0_3] : memref<128x4xi32, #tpu.memory_space<vmem>>, vector<128x1xi32>
    %c0_i32 = arith.constant 0 : i32
    %5 = vector.broadcast %c0_i32 : i32 to vector<128x1xi32>
    %6 = arith.subi %4, %5 : vector<128x1xi32>
    %7 = vector.broadcast %6 : vector<128x1xi32> to vector<128x128xi32>
    %8 = arith.cmpi eq, %0, %7 : vector<128x128xi32>
    %cst_4 = arith.constant 0.000000e+00 : f32
    %9 = vector.shape_cast %2 : vector<1x128xf32> to vector<1x128xf32>
    %10 = vector.broadcast %9 : vector<1x128xf32> to vector<128x128xf32>
    %11 = vector.broadcast %cst_4 : f32 to vector<128x128xf32>
    %12 = arith.select %8, %10, %11 : vector<128x128xi1>, vector<128x128xf32>
    %13 = arith.addf %3, %12 : vector<128x128xf32>
    %c0_5 = arith.constant 0 : index
    %c1 = arith.constant 1 : index
    %14 = vector.load %arg1[%c0_5, %c1] : memref<128x4xi32, #tpu.memory_space<vmem>>, vector<128x1xi32>
    %c0_i32_6 = arith.constant 0 : i32
    %15 = vector.broadcast %c0_i32_6 : i32 to vector<128x1xi32>
    %16 = arith.subi %14, %15 : vector<128x1xi32>
    %17 = vector.broadcast %16 : vector<128x1xi32> to vector<128x128xi32>
    %18 = arith.cmpi eq, %0, %17 : vector<128x128xi32>
    %cst_7 = arith.constant 0.000000e+00 : f32
    %19 = vector.shape_cast %2 : vector<1x128xf32> to vector<1x128xf32>
    %20 = vector.broadcast %19 : vector<1x128xf32> to vector<128x128xf32>
    %21 = vector.broadcast %cst_7 : f32 to vector<128x128xf32>
    %22 = arith.select %18, %20, %21 : vector<128x128xi1>, vector<128x128xf32>
    %23 = arith.addf %13, %22 : vector<128x128xf32>
    %c0_8 = arith.constant 0 : index
    %c2 = arith.constant 2 : index
    %24 = vector.load %arg1[%c0_8, %c2] : memref<128x4xi32, #tpu.memory_space<vmem>>, vector<128x1xi32>
    %c0_i32_9 = arith.constant 0 : i32
    %25 = vector.broadcast %c0_i32_9 : i32 to vector<128x1xi32>
    %26 = arith.subi %24, %25 : vector<128x1xi32>
    %27 = vector.broadcast %26 : vector<128x1xi32> to vector<128x128xi32>
    %28 = arith.cmpi eq, %0, %27 : vector<128x128xi32>
    %cst_10 = arith.constant 0.000000e+00 : f32
    %29 = vector.shape_cast %2 : vector<1x128xf32> to vector<1x128xf32>
    %30 = vector.broadcast %29 : vector<1x128xf32> to vector<128x128xf32>
    %31 = vector.broadcast %cst_10 : f32 to vector<128x128xf32>
    %32 = arith.select %28, %30, %31 : vector<128x128xi1>, vector<128x128xf32>
    %33 = arith.addf %23, %32 : vector<128x128xf32>
    %c0_11 = arith.constant 0 : index
    %c3 = arith.constant 3 : index
    %34 = vector.load %arg1[%c0_11, %c3] : memref<128x4xi32, #tpu.memory_space<vmem>>, vector<128x1xi32>
    %c0_i32_12 = arith.constant 0 : i32
    %35 = vector.broadcast %c0_i32_12 : i32 to vector<128x1xi32>
    %36 = arith.subi %34, %35 : vector<128x1xi32>
    %37 = vector.broadcast %36 : vector<128x1xi32> to vector<128x128xi32>
    %38 = arith.cmpi eq, %0, %37 : vector<128x128xi32>
    %cst_13 = arith.constant 0.000000e+00 : f32
    %39 = vector.shape_cast %2 : vector<1x128xf32> to vector<1x128xf32>
    %40 = vector.broadcast %39 : vector<1x128xf32> to vector<128x128xf32>
    %41 = vector.broadcast %cst_13 : f32 to vector<128x128xf32>
    %42 = arith.select %38, %40, %41 : vector<128x128xi1>, vector<128x128xf32>
    %43 = arith.addf %33, %42 : vector<128x128xf32>
    %cst_14 = arith.constant dense<0.000000e+00> : vector<128xf32>
    %44 = vector.multi_reduction <add>, %43, %cst_14 [1] : vector<128x128xf32> to vector<128xf32>
    %45 = vector.shape_cast %44 : vector<128xf32> to vector<128x1xf32>
    %46 = arith.addf %1, %45 : vector<128x1xf32>
    %c0_15 = arith.constant 0 : index
    %c128 = arith.constant 128 : index
    %47 = vector.load %arg2[%c0_15, %c128] : memref<1x384xf32, #tpu.memory_space<vmem>>, vector<1x128xf32>
    %cst_16 = arith.constant 0.000000e+00 : f32
    %48 = vector.broadcast %cst_16 : f32 to vector<128x128xf32>
    %c0_17 = arith.constant 0 : index
    %c0_18 = arith.constant 0 : index
    %49 = vector.load %arg1[%c0_17, %c0_18] : memref<128x4xi32, #tpu.memory_space<vmem>>, vector<128x1xi32>
    %c128_i32 = arith.constant 128 : i32
    %50 = vector.broadcast %c128_i32 : i32 to vector<128x1xi32>
    %51 = arith.subi %49, %50 : vector<128x1xi32>
    %52 = vector.broadcast %51 : vector<128x1xi32> to vector<128x128xi32>
    %53 = arith.cmpi eq, %0, %52 : vector<128x128xi32>
    %cst_19 = arith.constant 0.000000e+00 : f32
    %54 = vector.shape_cast %47 : vector<1x128xf32> to vector<1x128xf32>
    %55 = vector.broadcast %54 : vector<1x128xf32> to vector<128x128xf32>
    %56 = vector.broadcast %cst_19 : f32 to vector<128x128xf32>
    %57 = arith.select %53, %55, %56 : vector<128x128xi1>, vector<128x128xf32>
    %58 = arith.addf %48, %57 : vector<128x128xf32>
    %c0_20 = arith.constant 0 : index
    %c1_21 = arith.constant 1 : index
    %59 = vector.load %arg1[%c0_20, %c1_21] : memref<128x4xi32, #tpu.memory_space<vmem>>, vector<128x1xi32>
    %c128_i32_22 = arith.constant 128 : i32
    %60 = vector.broadcast %c128_i32_22 : i32 to vector<128x1xi32>
    %61 = arith.subi %59, %60 : vector<128x1xi32>
    %62 = vector.broadcast %61 : vector<128x1xi32> to vector<128x128xi32>
    %63 = arith.cmpi eq, %0, %62 : vector<128x128xi32>
    %cst_23 = arith.constant 0.000000e+00 : f32
    %64 = vector.shape_cast %47 : vector<1x128xf32> to vector<1x128xf32>
    %65 = vector.broadcast %64 : vector<1x128xf32> to vector<128x128xf32>
    %66 = vector.broadcast %cst_23 : f32 to vector<128x128xf32>
    %67 = arith.select %63, %65, %66 : vector<128x128xi1>, vector<128x128xf32>
    %68 = arith.addf %58, %67 : vector<128x128xf32>
    %c0_24 = arith.constant 0 : index
    %c2_25 = arith.constant 2 : index
    %69 = vector.load %arg1[%c0_24, %c2_25] : memref<128x4xi32, #tpu.memory_space<vmem>>, vector<128x1xi32>
    %c128_i32_26 = arith.constant 128 : i32
    %70 = vector.broadcast %c128_i32_26 : i32 to vector<128x1xi32>
    %71 = arith.subi %69, %70 : vector<128x1xi32>
    %72 = vector.broadcast %71 : vector<128x1xi32> to vector<128x128xi32>
    %73 = arith.cmpi eq, %0, %72 : vector<128x128xi32>
    %cst_27 = arith.constant 0.000000e+00 : f32
    %74 = vector.shape_cast %47 : vector<1x128xf32> to vector<1x128xf32>
    %75 = vector.broadcast %74 : vector<1x128xf32> to vector<128x128xf32>
    %76 = vector.broadcast %cst_27 : f32 to vector<128x128xf32>
    %77 = arith.select %73, %75, %76 : vector<128x128xi1>, vector<128x128xf32>
    %78 = arith.addf %68, %77 : vector<128x128xf32>
    %c0_28 = arith.constant 0 : index
    %c3_29 = arith.constant 3 : index
    %79 = vector.load %arg1[%c0_28, %c3_29] : memref<128x4xi32, #tpu.memory_space<vmem>>, vector<128x1xi32>
    %c128_i32_30 = arith.constant 128 : i32
    %80 = vector.broadcast %c128_i32_30 : i32 to vector<128x1xi32>
    %81 = arith.subi %79, %80 : vector<128x1xi32>
    %82 = vector.broadcast %81 : vector<128x1xi32> to vector<128x128xi32>
    %83 = arith.cmpi eq, %0, %82 : vector<128x128xi32>
    %cst_31 = arith.constant 0.000000e+00 : f32
    %84 = vector.shape_cast %47 : vector<1x128xf32> to vector<1x128xf32>
    %85 = vector.broadcast %84 : vector<1x128xf32> to vector<128x128xf32>
    %86 = vector.broadcast %cst_31 : f32 to vector<128x128xf32>
    %87 = arith.select %83, %85, %86 : vector<128x128xi1>, vector<128x128xf32>
    %88 = arith.addf %78, %87 : vector<128x128xf32>
    %cst_32 = arith.constant dense<0.000000e+00> : vector<128xf32>
    %89 = vector.multi_reduction <add>, %88, %cst_32 [1] : vector<128x128xf32> to vector<128xf32>
    %90 = vector.shape_cast %89 : vector<128xf32> to vector<128x1xf32>
    %91 = arith.addf %46, %90 : vector<128x1xf32>
    %c0_33 = arith.constant 0 : index
    %c256 = arith.constant 256 : index
    %92 = vector.load %arg2[%c0_33, %c256] : memref<1x384xf32, #tpu.memory_space<vmem>>, vector<1x128xf32>
    %cst_34 = arith.constant 0.000000e+00 : f32
    %93 = vector.broadcast %cst_34 : f32 to vector<128x128xf32>
    %c0_35 = arith.constant 0 : index
    %c0_36 = arith.constant 0 : index
    %94 = vector.load %arg1[%c0_35, %c0_36] : memref<128x4xi32, #tpu.memory_space<vmem>>, vector<128x1xi32>
    %c256_i32 = arith.constant 256 : i32
    %95 = vector.broadcast %c256_i32 : i32 to vector<128x1xi32>
    %96 = arith.subi %94, %95 : vector<128x1xi32>
    %97 = vector.broadcast %96 : vector<128x1xi32> to vector<128x128xi32>
    %98 = arith.cmpi eq, %0, %97 : vector<128x128xi32>
    %cst_37 = arith.constant 0.000000e+00 : f32
    %99 = vector.shape_cast %92 : vector<1x128xf32> to vector<1x128xf32>
    %100 = vector.broadcast %99 : vector<1x128xf32> to vector<128x128xf32>
    %101 = vector.broadcast %cst_37 : f32 to vector<128x128xf32>
    %102 = arith.select %98, %100, %101 : vector<128x128xi1>, vector<128x128xf32>
    %103 = arith.addf %93, %102 : vector<128x128xf32>
    %c0_38 = arith.constant 0 : index
    %c1_39 = arith.constant 1 : index
    %104 = vector.load %arg1[%c0_38, %c1_39] : memref<128x4xi32, #tpu.memory_space<vmem>>, vector<128x1xi32>
    %c256_i32_40 = arith.constant 256 : i32
    %105 = vector.broadcast %c256_i32_40 : i32 to vector<128x1xi32>
    %106 = arith.subi %104, %105 : vector<128x1xi32>
    %107 = vector.broadcast %106 : vector<128x1xi32> to vector<128x128xi32>
    %108 = arith.cmpi eq, %0, %107 : vector<128x128xi32>
    %cst_41 = arith.constant 0.000000e+00 : f32
    %109 = vector.shape_cast %92 : vector<1x128xf32> to vector<1x128xf32>
    %110 = vector.broadcast %109 : vector<1x128xf32> to vector<128x128xf32>
    %111 = vector.broadcast %cst_41 : f32 to vector<128x128xf32>
    %112 = arith.select %108, %110, %111 : vector<128x128xi1>, vector<128x128xf32>
    %113 = arith.addf %103, %112 : vector<128x128xf32>
    %c0_42 = arith.constant 0 : index
    %c2_43 = arith.constant 2 : index
    %114 = vector.load %arg1[%c0_42, %c2_43] : memref<128x4xi32, #tpu.memory_space<vmem>>, vector<128x1xi32>
    %c256_i32_44 = arith.constant 256 : i32
    %115 = vector.broadcast %c256_i32_44 : i32 to vector<128x1xi32>
    %116 = arith.subi %114, %115 : vector<128x1xi32>
    %117 = vector.broadcast %116 : vector<128x1xi32> to vector<128x128xi32>
    %118 = arith.cmpi eq, %0, %117 : vector<128x128xi32>
    %cst_45 = arith.constant 0.000000e+00 : f32
    %119 = vector.shape_cast %92 : vector<1x128xf32> to vector<1x128xf32>
    %120 = vector.broadcast %119 : vector<1x128xf32> to vector<128x128xf32>
    %121 = vector.broadcast %cst_45 : f32 to vector<128x128xf32>
    %122 = arith.select %118, %120, %121 : vector<128x128xi1>, vector<128x128xf32>
    %123 = arith.addf %113, %122 : vector<128x128xf32>
    %c0_46 = arith.constant 0 : index
    %c3_47 = arith.constant 3 : index
    %124 = vector.load %arg1[%c0_46, %c3_47] : memref<128x4xi32, #tpu.memory_space<vmem>>, vector<128x1xi32>
    %c256_i32_48 = arith.constant 256 : i32
    %125 = vector.broadcast %c256_i32_48 : i32 to vector<128x1xi32>
    %126 = arith.subi %124, %125 : vector<128x1xi32>
    %127 = vector.broadcast %126 : vector<128x1xi32> to vector<128x128xi32>
    %128 = arith.cmpi eq, %0, %127 : vector<128x128xi32>
    %cst_49 = arith.constant 0.000000e+00 : f32
    %129 = vector.shape_cast %92 : vector<1x128xf32> to vector<1x128xf32>
    %130 = vector.broadcast %129 : vector<1x128xf32> to vector<128x128xf32>
    %131 = vector.broadcast %cst_49 : f32 to vector<128x128xf32>
    %132 = arith.select %128, %130, %131 : vector<128x128xi1>, vector<128x128xf32>
    %133 = arith.addf %123, %132 : vector<128x128xf32>
    %cst_50 = arith.constant dense<0.000000e+00> : vector<128xf32>
    %134 = vector.multi_reduction <add>, %133, %cst_50 [1] : vector<128x128xf32> to vector<128xf32>
    %135 = vector.shape_cast %134 : vector<128xf32> to vector<128x1xf32>
    %136 = arith.addf %91, %135 : vector<128x1xf32>
    %c0_51 = arith.constant 0 : index
    %c0_52 = arith.constant 0 : index
    %137 = vector.load %arg3[%c0_51, %c0_52] : memref<128x1xf32, #tpu.memory_space<vmem>>, vector<128x1xf32>
    tpu.vector_store %arg3[%c0_51, %c0_52], %136 {strides = array<i32>} : memref<128x1xf32, #tpu.memory_space<vmem>>, vector<128x1xf32>,
    return
  }
  func.func @transform_0(%arg0: i32) -> (i32, i32) {
    %c0_i32 = arith.constant 0 : i32
    %c0_i32_0 = arith.constant 0 : i32
    return %arg0, %c0_i32 : i32, i32
  }
  func.func @transform_1(%arg0: i32) -> (i32, i32) {
    %c0_i32 = arith.constant 0 : i32
    %c0_i32_0 = arith.constant 0 : i32
    %c0_i32_1 = arith.constant 0 : i32
    return %c0_i32, %c0_i32_0 : i32, i32
  }
  func.func @transform_2(%arg0: i32) -> (i32, i32) {
    %c0_i32 = arith.constant 0 : i32
    %c0_i32_0 = arith.constant 0 : i32
    return %arg0, %c0_i32 : i32, i32
  }
}

</mosaic_0001>

<bundles_post_ra>
// kernel: tpu_custom_call.1
= control target key start
LH: loop header
LB: loop body
LE: loop exit
PB: predicated region body
PF: predicated region fallthrough
CT: control target
= control target key end

     0   :  { %s1710_s9 = smov 0   ;;  %s3057_s0 = inlined_call_operand.vmem [shape: s32[256,4], index: 0, kind: input, shape index: {}]   ;;  %s3058_s1 = inlined_call_operand.vmem [shape: f32[1,384], index: 1, kind: input, shape index: {}]   ;;  %s3059_s2 = inlined_call_operand.vmem [shape: f32[256,1], index: 2, kind: output, shape index: {}]  }
   0x1 LB: > { %s1587_s10 = sadd.s32 4294967295, %s1689_s9   ;;  %p1591_p0 = scmp.ge.s32.totalorder %s1689_s9, 1  ;;  %s1689_s9 = sphi %s1710_s9, %s12_s9  }
   0x2   : > { %p113_p1 = scmp.lt.s32.totalorder %s1689_s9, 3 }
   0x4   : > { %p114_p2 = pnand %p1591_p0, %p113_p1 }
   0x6   : > { %117 = sbr.rel (%p114_p2) target bundleno = 1143 (0x477), region = 28 }
   0xd   : > { %s1592_s11 = sshll.u32 %s1587_s10, 4  ;;  %v3062_v0 = vmov 0   ;;  %v3060_v17 = vmov 1   ;;  %v3066_v18 = vmov 2   ;;  %v3064_v19 = vmov 3  }
   0xe   : > { %1646 = vset.pattern.permute.xlu1 %v3062_v0  ;;  %1645 = vset.pattern.permute.xlu0 %v3062_v0  ;;  %p136_p3 = scmp.lt.s32.totalorder %s1592_s11, 31  ;;  %v147_v58 = vlaneseq }
  0x10   : > { %s3115_s11 = smov (!%p136_p3, %s1592_s11), 31  ;;  %v1918_v61 = vand.u32 127, %v147_v58 }
  0x11   : > { %s1593_s12 = sshll.u32 %s3115_s11, 3 }
  0x12   : > { %s1728_s15 = scalar_lea.vmem %s3057_s0, %s1593_s12  ;;  %s2990_s24 = scalar_lea.vmem %s3059_s2, %s1593_s12 }
  0x13   : > { %v1731_v1 = vld [vmem:[%s1728_s15 + $0x10] sm:$0xff]  ;;  %v1734_v2 = vld [vmem:[%s1728_s15] sm:$0xff]  ;;  %v1739_v3 = vld [vmem:[%s1728_s15 + $0x18] sm:$0xff] }
  0x14   : > { %3072 = vst [vmem:[#allocation2_spill] sm:$0xff] %v1731_v1  ;;  %173 = vperm.xlu1 %1646, %v1731_v1   ;;  %167 = vperm.xlu0 %1645, %v1734_v2   ;;  %v1742_v4 = vld [vmem:[%s1728_s15 + $0x8] sm:$0xff]  ;;  %v1750_v6 = vld [vmem:[%s1728_s15 + $0x20] sm:$0xff]  ;;  %v1755_v7 = vld [vmem:[%s1728_s15 + $0x38] sm:$0xff] }
  0x15   : > { %v1747_v5 = vld [vmem:[%s1728_s15 + $0x28] sm:$0xff]  ;;  %v1758_v8 = vld [vmem:[%s1728_s15 + $0x30] sm:$0xff]  ;;  %v1766_v10 = vld [vmem:[%s1728_s15 + $0x40] sm:$0xff] }
  0x16   : > { %v1763_v9 = vld [vmem:[%s1728_s15 + $0x48] sm:$0xff]  ;;  %v1771_v11 = vld [vmem:[%s1728_s15 + $0x58] sm:$0xff]  ;;  %v1774_v12 = vld [vmem:[%s1728_s15 + $0x50] sm:$0xff] }
  0x17   : > { %3073 = vst [vmem:[#allocation3_spill] sm:$0xff] %v1763_v9  ;;  %3074 = vst [vmem:[#allocation4_spill] sm:$0xff] %v1771_v11  ;;  %v1779_v13 = vld [vmem:[%s1728_s15 + $0x68] sm:$0xff]  ;;  %v1782_v14 = vld [vmem:[%s1728_s15 + $0x60] sm:$0xff] }
  0x18   : > { %176 = vperm.xlu1 %1646, %v1739_v3   ;;  %170 = vperm.xlu0 %1645, %v1742_v4   ;;  %3075 = vst [vmem:[#allocation5_spill] sm:$0xff] %v1779_v13  ;;  %v1787_v15 = vld [vmem:[%s1728_s15 + $0x78] sm:$0xff]  ;;  %v1790_v16 = vld [vmem:[%s1728_s15 + $0x70] sm:$0xff] }
  0x1c   : > { %182 = vperm.xlu1 %1646, %v1747_v5   ;;  %179 = vperm.xlu0 %1645, %v1750_v6  }
  0x20   : > { %188 = vperm.xlu1 %1646, %v1755_v7   ;;  %185 = vperm.xlu0 %1645, %v1758_v8  }
  0x24   : > { %194 = vperm.xlu1 %1646, %v1763_v9   ;;  %191 = vperm.xlu0 %1645, %v1766_v10  }
  0x28   : > { %200 = vperm.xlu1 %1646, %v1771_v11   ;;  %197 = vperm.xlu0 %1645, %v1774_v12  }
  0x2c   : > { %206 = vperm.xlu1 %1646, %v1779_v13   ;;  %203 = vperm.xlu0 %1645, %v1782_v14  }
  0x30   : > { %212 = vperm.xlu1 %1646, %v1787_v15   ;;  %209 = vperm.xlu0 %1645, %v1790_v16  }
  0x34   : > { %1647 = vset.pattern.permute.xlu1 %v3060_v17  ;;  %1649 = vset.pattern.permute.xlu0 %v3066_v18 }
  0x35   : > { %272 = vperm.xlu1 %1647, %v1742_v4   ;;  %368 = vperm.xlu0 %1649, %v1742_v4  }
  0x39   : > { %275 = vperm.xlu1 %1647, %v1731_v1   ;;  %377 = vperm.xlu0 %1649, %v1750_v6  }
  0x3d   : > { %281 = vperm.xlu1 %1647, %v1750_v6   ;;  %383 = vperm.xlu0 %1649, %v1758_v8  }
  0x41   : > { %287 = vperm.xlu1 %1647, %v1758_v8   ;;  %389 = vperm.xlu0 %1649, %v1766_v10  }
  0x45   : > { %293 = vperm.xlu1 %1647, %v1766_v10   ;;  %395 = vperm.xlu0 %1649, %v1774_v12  }
  0x49   : > { %299 = vperm.xlu1 %1647, %v1774_v12   ;;  %401 = vperm.xlu0 %1649, %v1782_v14  }
  0x4d   : > { %305 = vperm.xlu1 %1647, %v1782_v14   ;;  %407 = vperm.xlu0 %1649, %v1790_v16  }
  0x51   : > { %311 = vperm.xlu1 %1647, %v1790_v16   ;;  %1650 = vset.pattern.permute.xlu0 %v3064_v19 }
  0x52   : > { %461 = vperm.xlu0 %1650, %v1734_v2  }
  0x55   : > { %1648 = vset.pattern.permute.xlu1 %v3066_v18 }
  0x56   : > { %365 = vperm.xlu1 %1648, %v1734_v2   ;;  %470 = vperm.xlu0 %1650, %v1739_v3  }
  0x5a   : > { %371 = vperm.xlu1 %1648, %v1731_v1   ;;  %476 = vperm.xlu0 %1650, %v1747_v5  }
  0x5e   : > { %374 = vperm.xlu1 %1648, %v1739_v3   ;;  %482 = vperm.xlu0 %1650, %v1755_v7  }
  0x62   : > { %380 = vperm.xlu1 %1648, %v1747_v5   ;;  %488 = vperm.xlu0 %1650, %v1763_v9  }
  0x66   : > { %386 = vperm.xlu1 %1648, %v1755_v7   ;;  %494 = vperm.xlu0 %1650, %v1771_v11  }
  0x6a   : > { %392 = vperm.xlu1 %1648, %v1763_v9   ;;  %500 = vperm.xlu0 %1650, %v1779_v13  }
  0x6e   : > { %398 = vperm.xlu1 %1648, %v1771_v11   ;;  %506 = vperm.xlu0 %1650, %v1787_v15  }
  0x72   : > { %404 = vperm.xlu1 %1648, %v1779_v13   ;;  %1652 = vset.pattern.permute.xlu0 %v3060_v17  ;;  %v1927_v17 = vld [vmem:[%s3058_s1] ss:$0 sm:$0xff] }
  0x73   : > { %269 = vperm.xlu0 %1652, %v1734_v2  }
  0x76   : > { %410 = vperm.xlu1 %1648, %v1787_v15  }
  0x77   : > { %278 = vperm.xlu0 %1652, %v1739_v3  }
  0x7a   : > { %1651 = vset.pattern.permute.xlu1 %v3064_v19 }
  0x7b   : > { %464 = vperm.xlu1 %1651, %v1742_v4   ;;  %284 = vperm.xlu0 %1652, %v1747_v5  }
  0x7f   : > { %467 = vperm.xlu1 %1651, %v1731_v1   ;;  %290 = vperm.xlu0 %1652, %v1755_v7  }
  0x83   : > { %473 = vperm.xlu1 %1651, %v1750_v6   ;;  %296 = vperm.xlu0 %1652, %v1763_v9  }
  0x87   : > { %479 = vperm.xlu1 %1651, %v1758_v8   ;;  %302 = vperm.xlu0 %1652, %v1771_v11  }
  0x8b   : > { %485 = vperm.xlu1 %1651, %v1766_v10   ;;  %308 = vperm.xlu0 %1652, %v1779_v13  }
  0x8f   : > { %491 = vperm.xlu1 %1651, %v1774_v12  }
  0x93   : > { %v174_v20 = vpop.permute.xlu1 %173  ;;  %497 = vperm.xlu1 %1651, %v1782_v14   ;;  %v1846_v21 = vpop.permute.xlu0 %167 }
  0x94   : > { %vm216_vm0 = vcmp.eq.s32.totalorder %v1918_v61, %v174_v20  ;;  %vm214_vm3 = vcmp.eq.s32.totalorder %v1918_v61, %v1846_v21 }
  0x95   : > { %v238_v58 = vsel %vm216_vm0, %v1927_v17, 0.0 }
  0x97   : > { %v1848_v22 = vpop.permute.xlu1 %176  ;;  %503 = vperm.xlu1 %1651, %v1790_v16   ;;  %v171_v23 = vpop.permute.xlu0 %170 }
  0x98   : > { %vm215_vm1 = vcmp.eq.s32.totalorder %v1918_v61, %v171_v23  ;;  %vm217_vm4 = vcmp.eq.s32.totalorder %v1918_v61, %v1848_v22 }
  0x99   : > { %v237_v20 = vsel %vm215_vm1, %v1927_v17, 0.0 }
  0x9b   : > { %v1851_v24 = vpop.permute.xlu1 %182  ;;  %v1853_v25 = vpop.permute.xlu0 %179  ;;  %1653 = vset.pattern.permute.xlu1 %v3062_v0 }
  0x9c   : > { %vm219_vm5 = vcmp.eq.s32.totalorder %v1918_v61, %v1851_v24  ;;  %vm218_vm6 = vcmp.eq.s32.totalorder %v1918_v61, %v1853_v25  ;;  %v239_v24 = vsel %vm217_vm4, %v1927_v17, 0.0 }
  0x9d   : > { %v1961_v25 = vsel %vm219_vm5, %v1927_v17, 0.0 }
  0x9f   : > { %v1856_v26 = vpop.permute.xlu1 %188  ;;  %v1858_v27 = vpop.permute.xlu0 %185 }
  0xa0   : > { %vm221_vm7 = vcmp.eq.s32.totalorder %v1918_v61, %v1856_v26  ;;  %vm220_vm8 = vcmp.eq.s32.totalorder %v1918_v61, %v1858_v27  ;;  %v240_v26 = vsel %vm218_vm6, %v1927_v17, 0.0 }
  0xa1   : > { %v1968_v27 = vsel %vm221_vm7, %v1927_v17, 0.0  ;;  %v242_v18 = vsel %vm220_vm8, %v1927_v17, 0.0 }
  0xa3   : > { %v1860_v28 = vpop.permute.xlu1 %194  ;;  %v1862_v29 = vpop.permute.xlu0 %191 }
  0xa4   : > { %vm223_vm9 = vcmp.eq.s32.totalorder %v1918_v61, %v1860_v28  ;;  %vm222_vm11 = vcmp.eq.s32.totalorder %v1918_v61, %v1862_v29 }
  0xa5   : > { %v1984_v1 = vsel %vm222_vm11, %v1927_v17, 0.0 }
  0xa7   : > { %v1864_v30 = vpop.permute.xlu1 %200  ;;  %v1866_v31 = vpop.permute.xlu0 %197 }
  0xa8   : > { %vm225_vm13 = vcmp.eq.s32.totalorder %v1918_v61, %v1864_v30  ;;  %vm224_vm14 = vcmp.eq.s32.totalorder %v1918_v61, %v1866_v31 }
  0xa9   : > { %v1992_v31 = vsel %vm225_vm13, %v1927_v17, 0.0 }
  0xab   : > { %v1868_v32 = vpop.permute.xlu1 %206  ;;  %v1870_v33 = vpop.permute.xlu0 %203 }
  0xac   : > { %vm227_vm15 = vcmp.eq.s32.totalorder %v1918_v61, %v1868_v32  ;;  %v2000_v32 = vsel %vm224_vm14, %v1927_v17, 0.0 }
  0xaf   : > { %v1872_v34 = vpop.permute.xlu1 %212  ;;  %v1874_v35 = vpop.permute.xlu0 %209 }
  0xb0   : > { %3076 = vst [vmem:[#allocation6_spill] sm:$0xff] %v1872_v34 }
  0xb4   : > { %v273_v36 = vpop.permute.xlu1 %272  ;;  %v369_v37 = vpop.permute.xlu0 %368 }
  0xb5   : > { %vm317_vm2 = vcmp.eq.s32.totalorder %v1918_v61, %v273_v36  ;;  %v236_v36 = vsel %vm214_vm3, %v1927_v17, 0.0  ;;  %vm413_vm10 = vcmp.eq.s32.totalorder %v1918_v61, %v369_v37  ;;  %v1974_v37 = vsel %vm223_vm9, %v1927_v17, 0.0 }
  0xb6   : > { %v333_v21 = vsel %vm317_vm2, %v1927_v17, 0.0  ;;  %v429_v29 = vsel %vm413_vm10, %v1927_v17, 0.0 }
  0xb7   : > { %v349_v28 = vadd.f32 %v333_v21, %v237_v20 }
  0xb8   : > { %v1876_v38 = vpop.permute.xlu1 %275  ;;  %v1878_v39 = vpop.permute.xlu0 %377 }
  0xb9   : > { %vm318_vm0 = vcmp.eq.s32.totalorder %v1918_v61, %v1876_v38  ;;  %vm416_vm1 = vcmp.eq.s32.totalorder %v1918_v61, %v1878_v39  ;;  %v2003_v38 = vsel %vm227_vm15, %v1927_v17, 0.0  ;;  %v445_v21 = vadd.f32 %v429_v29, %v349_v28 }
  0xba   : > { %v432_v34 = vsel %vm416_vm1, %v1927_v17, 0.0 }
  0xbc   : > { %v282_v40 = vpop.permute.xlu1 %281  ;;  %v1880_v41 = vpop.permute.xlu0 %383 }
  0xbd   : > { %vm320_vm12 = vcmp.eq.s32.totalorder %v1918_v61, %v282_v40  ;;  %vm418_vm10 = vcmp.eq.s32.totalorder %v1918_v61, %v1880_v41 }
  0xbe   : > { %v336_v30 = vsel %vm320_vm12, %v1927_v17, 0.0 }
  0xbf   : > { %v352_v13 = vadd.f32 %v336_v30, %v240_v26 }
  0xc0   : > { %v1882_v42 = vpop.permute.xlu1 %287  ;;  %v1884_v43 = vpop.permute.xlu0 %389 }
  0xc1   : > { %vm322_vm5 = vcmp.eq.s32.totalorder %v1918_v61, %v1882_v42  ;;  %vm420_vm11 = vcmp.eq.s32.totalorder %v1918_v61, %v1884_v43 }
  0xc4   : > { %v1886_v44 = vpop.permute.xlu1 %293  ;;  %v1888_v45 = vpop.permute.xlu0 %395 }
  0xc5   : > { %vm324_vm1 = vcmp.eq.s32.totalorder %v1918_v61, %v1886_v44 }
  0xc8   : > { %v1890_v46 = vpop.permute.xlu1 %299  ;;  %v1892_v47 = vpop.permute.xlu0 %401 }
  0xcc   : > { %v1894_v48 = vpop.permute.xlu1 %305  ;;  %v1896_v49 = vpop.permute.xlu0 %407 }
  0xd0   : > { %v1898_v50 = vpop.permute.xlu1 %311 }
  0xd1   : > { %v1900_v51 = vpop.permute.xlu0 %461 }
  0xd2   : > { %vm508_vm2 = vcmp.eq.s32.totalorder %v1918_v61, %v1900_v51  ;;  %v338_v51 = vsel %vm322_vm5, %v1927_v17, 0.0 }
  0xd3   : > { %v524_v28 = vsel %vm508_vm2, %v1927_v17, 0.0 }
  0xd5   : > { %v1902_v52 = vpop.permute.xlu1 %365  ;;  %v1904_v53 = vpop.permute.xlu0 %470 }
  0xd6   : > { %vm412_vm3 = vcmp.eq.s32.totalorder %v1918_v61, %v1902_v52  ;;  %vm511_vm6 = vcmp.eq.s32.totalorder %v1918_v61, %v1904_v53 }
  0xd7   : > { %v428_v52 = vsel %vm412_vm3, %v1927_v17, 0.0 }
  0xd9   : > { %v1906_v54 = vpop.permute.xlu1 %371  ;;  %v1908_v55 = vpop.permute.xlu0 %476 }
  0xda   : > { %vm414_vm7 = vcmp.eq.s32.totalorder %v1918_v61, %v1906_v54  ;;  %v448_v54 = vadd.f32 %v432_v34, %v352_v13  ;;  %vm513_vm12 = vcmp.eq.s32.totalorder %v1918_v61, %v1908_v55  ;;  %v354_v34 = vadd.f32 %v338_v51, %v242_v18 }
  0xdd   : > { %v1910_v56 = vpop.permute.xlu1 %374  ;;  %v1912_v57 = vpop.permute.xlu0 %482 }
  0xde   : > { %vm415_vm8 = vcmp.eq.s32.totalorder %v1918_v61, %v1910_v56  ;;  %vm515_vm2 = vcmp.eq.s32.totalorder %v1918_v61, %v1912_v57 }
  0xe1   : > { %v1914_v59 = vpop.permute.xlu1 %380  ;;  %v1916_v60 = vpop.permute.xlu0 %488 }
  0xe2   : > { %vm417_vm13 = vcmp.eq.s32.totalorder %v1918_v61, %v1914_v59 }
  0xe3   : > { %v433_v18 = vsel %vm417_vm13, %v1927_v17, 0.0  ;;  %vm228_vm13 = vcmp.eq.s32.totalorder %v1918_v61, %v1874_v35 }
  0xe5   : > { %v1920_v62 = vpop.permute.xlu1 %386  ;;  %v1922_v63 = vpop.permute.xlu0 %494 }
  0xe6   : > { %vm419_vm3 = vcmp.eq.s32.totalorder %v1918_v61, %v1920_v62 }
  0xe7   : > { %v435_v44 = vsel %vm419_vm3, %v1927_v17, 0.0 }
  0xe9   : > { %v1930_v0 = vpop.permute.xlu1 %392  ;;  %v1932_v19 = vpop.permute.xlu0 %500 }
  0xed   : > { %v1951_v23 = vpop.permute.xlu1 %398  ;;  %v1953_v22 = vpop.permute.xlu0 %506 }
  0xee   : > { %3077 = vst [vmem:[#allocation7_spill] sm:$0xff] %v1953_v22  ;;  %v334_v22 = vsel %vm318_vm0, %v1927_v17, 0.0  ;;  %vm226_vm0 = vcmp.eq.s32.totalorder %v1918_v61, %v1870_v33 }
  0xf1   : > { %v1981_v40 = vpop.permute.xlu1 %404 }
  0xf2   : > { %v270_v20 = vpop.permute.xlu0 %269  ;;  %vm425_vm3 = vcmp.eq.s32.totalorder %v1918_v61, %v1981_v40 }
  0xf3   : > { %vm316_vm4 = vcmp.eq.s32.totalorder %v1918_v61, %v270_v20 }
  0xf4   : > { %v332_v39 = vsel %vm316_vm4, %v1927_v17, 0.0 }
  0xf5   : > { %v348_v11 = vadd.f32 %v332_v39, %v236_v36  ;;  %v2008_v9 = vpop.permute.xlu1 %410  ;;  %v350_v36 = vadd.f32 %v334_v22, %v238_v58  ;;  %v430_v39 = vsel %vm414_vm7, %v1927_v17, 0.0  ;;  %v527_v22 = vsel %vm511_vm6, %v1927_v17, 0.0 }
  0xf6   : > { %v279_v20 = vpop.permute.xlu0 %278  ;;  %vm422_vm6 = vcmp.eq.s32.totalorder %v1918_v61, %v1888_v45  ;;  %vm326_vm7 = vcmp.eq.s32.totalorder %v1918_v61, %v1890_v46 }
  0xf7   : > { %vm319_vm9 = vcmp.eq.s32.totalorder %v1918_v61, %v279_v20  ;;  %v444_v42 = vadd.f32 %v428_v52, %v348_v11  ;;  %v431_v11 = vsel %vm415_vm8, %v1927_v17, 0.0  ;;  %v446_v51 = vadd.f32 %v430_v39, %v350_v36 }
  0xf8   : > { %v335_v26 = vsel %vm319_vm9, %v1927_v17, 0.0  ;;  %vm517_vm8 = vcmp.eq.s32.totalorder %v1918_v61, %v1916_v60  ;;  %vm421_vm9 = vcmp.eq.s32.totalorder %v1918_v61, %v1930_v0  ;;  %v342_v43 = vsel %vm326_vm7, %v1927_v17, 0.0 }
  0xf9   : > { %v351_v29 = vadd.f32 %v335_v26, %v239_v24  ;;  %v540_v30 = vadd.f32 %v524_v28, %v444_v42  ;;  %v529_v28 = vsel %vm513_vm12, %v1927_v17, 0.0  ;;  %v533_v46 = vsel %vm517_vm8, %v1927_v17, 0.0 }
  0xfa   : > { %v465_v56 = vpop.permute.xlu1 %464  ;;  %v285_v58 = vpop.permute.xlu0 %284  ;;  %vm424_vm7 = vcmp.eq.s32.totalorder %v1918_v61, %v1892_v47 }
  0xfb   : > { %vm509_vm14 = vcmp.eq.s32.totalorder %v1918_v61, %v465_v56  ;;  %vm321_vm15 = vcmp.eq.s32.totalorder %v1918_v61, %v285_v58  ;;  %556 = vadd.xlane.f32.xlu1 %v540_v30  ;;  %v447_v13 = vadd.f32 %v431_v11, %v351_v29  ;;  %v436_v58 = vsel %vm420_vm11, %v1927_v17, 0.0 }
  0xfc   : > { %v337_v24 = vsel %vm321_vm15, %v1927_v17, 0.0  ;;  %v525_v53 = vsel %vm509_vm14, %v1927_v17, 0.0  ;;  %vm519_vm11 = vcmp.eq.s32.totalorder %v1918_v61, %v1922_v63  ;;  %vm423_vm14 = vcmp.eq.s32.totalorder %v1918_v61, %v1951_v23 }
  0xfd   : > { %v353_v52 = vadd.f32 %v337_v24, %v1961_v25  ;;  %v541_v59 = vadd.f32 %v525_v53, %v445_v21  ;;  %v543_v20 = vadd.f32 %v527_v22, %v447_v13  ;;  %v434_v25 = vsel %vm418_vm10, %v1927_v17, 0.0 }
  0xfe   : > { %v468_v42 = vpop.permute.xlu1 %467  ;;  %v291_v26 = vpop.permute.xlu0 %290  ;;  %v340_v21 = vsel %vm324_vm1, %v1927_v17, 0.0  ;;  %v450_v57 = vadd.f32 %v434_v25, %v354_v34  ;;  %v440_v40 = vsel %vm424_vm7, %v1927_v17, 0.0 }
  0xff   : > { %vm510_vm4 = vcmp.eq.s32.totalorder %v1918_v61, %v468_v42  ;;  %vm323_vm5 = vcmp.eq.s32.totalorder %v1918_v61, %v291_v26  ;;  %558 = vadd.xlane.f32.xlu0 %v541_v59  ;;  %562 = vadd.xlane.f32.xlu1 %v543_v20  ;;  %v449_v55 = vadd.f32 %v433_v18, %v353_v52 }
 0x100   : > { %v339_v36 = vsel %vm323_vm5, %v1927_v17, 0.0  ;;  %v526_v41 = vsel %vm510_vm4, %v1927_v17, 0.0  ;;  %v356_v22 = vadd.f32 %v340_v21, %v1984_v1  ;;  %v437_v1 = vsel %vm421_vm9, %v1927_v17, 0.0 }
 0x101   : > { %v355_v29 = vadd.f32 %v339_v36, %v1968_v27  ;;  %v542_v30 = vadd.f32 %v526_v41, %v446_v51  ;;  %v545_v39 = vadd.f32 %v529_v28, %v449_v55  ;;  %v531_v27 = vsel %vm515_vm2, %v1927_v17, 0.0 }
 0x102   : > { %v474_v11 = vpop.permute.xlu1 %473  ;;  %v297_v56 = vpop.permute.xlu0 %296  ;;  %v452_v60 = vadd.f32 %v436_v58, %v356_v22  ;;  %vm328_vm2 = vcmp.eq.s32.totalorder %v1918_v61, %v1894_v48  ;;  %v438_v55 = vsel %vm422_vm6, %v1927_v17, 0.0  ;;  %vm330_vm6 = vcmp.eq.s32.totalorder %v1918_v61, %v1898_v50 }
 0x103   : > { %vm512_vm10 = vcmp.eq.s32.totalorder %v1918_v61, %v474_v11  ;;  %vm325_vm12 = vcmp.eq.s32.totalorder %v1918_v61, %v297_v56  ;;  %560 = vadd.xlane.f32.xlu0 %v542_v30  ;;  %566 = vadd.xlane.f32.xlu1 %v545_v39  ;;  %v451_v62 = vadd.f32 %v435_v44, %v355_v29  ;;  %v344_v63 = vsel %vm328_vm2, %v1927_v17, 0.0 }
 0x104   : > { %v341_v13 = vsel %vm325_vm12, %v1927_v17, 0.0  ;;  %v528_v24 = vsel %vm512_vm10, %v1927_v17, 0.0  ;;  %v441_v30 = vsel %vm425_vm3, %v1927_v17, 0.0  ;;  %v346_v56 = vsel %vm330_vm6, %v1927_v17, 0.0 }
 0x105   : > { %v357_v53 = vadd.f32 %v341_v13, %v1974_v37  ;;  %v544_v52 = vadd.f32 %v528_v24, %v448_v54  ;;  %v547_v59 = vadd.f32 %v531_v27, %v451_v62  ;;  %v248_v37 = vsel %vm226_vm0, %v1927_v17, 0.0 }
 0x106   : > { %v480_v34 = vpop.permute.xlu1 %479  ;;  %v303_v20 = vpop.permute.xlu0 %302  ;;  %v358_v54 = vadd.f32 %v342_v43, %v2000_v32  ;;  %vm521_vm0 = vcmp.eq.s32.totalorder %v1918_v61, %v1932_v19  ;;  %v439_v32 = vsel %vm423_vm14, %v1927_v17, 0.0  ;;  %v360_v11 = vadd.f32 %v344_v63, %v248_v37  ;;  %v3080_v37 = vld [vmem:[#allocation4_spill] sm:$0xff]  ;;  %v3088_v63 = vld [vmem:[#allocation7_spill] sm:$0xff] }
 0x107   : > { %vm514_vm15 = vcmp.eq.s32.totalorder %v1918_v61, %v480_v34  ;;  %vm327_vm1 = vcmp.eq.s32.totalorder %v1918_v61, %v303_v20  ;;  %564 = vadd.xlane.f32.xlu0 %v544_v52  ;;  %570 = vadd.xlane.f32.xlu1 %v547_v59  ;;  %v453_v0 = vadd.f32 %v437_v1, %v357_v53  ;;  %v537_v48 = vsel %vm521_vm0, %v1927_v17, 0.0 }
 0x108   : > { %v343_v28 = vsel %vm327_vm1, %v1927_v17, 0.0  ;;  %v530_v18 = vsel %vm514_vm15, %v1927_v17, 0.0  ;;  %v454_v44 = vadd.f32 %v438_v55, %v358_v54  ;;  %vm426_vm9 = vcmp.eq.s32.totalorder %v1918_v61, %v1896_v49 }
 0x109   : > { %v359_v33 = vadd.f32 %v343_v28, %v1992_v31  ;;  %v546_v42 = vadd.f32 %v530_v18, %v450_v57  ;;  %v549_v26 = vadd.f32 %v533_v46, %v453_v0  ;;  %v535_v31 = vsel %vm519_vm11, %v1927_v17, 0.0  ;;  %v3081_v0 = vld [vmem:[#allocation5_spill] sm:$0xff] }
 0x10a   : > { %v486_v51 = vpop.permute.xlu1 %485  ;;  %v309_v25 = vpop.permute.xlu0 %308  ;;  %v456_v35 = vadd.f32 %v440_v40, %v360_v11  ;;  %v442_v13 = vsel %vm426_vm9, %v1927_v17, 0.0  ;;  %v2184_v52 = vadd.s32 4294967168, %v1742_v4  ;;  %v2188_v59 = vadd.s32 4294967168, %v1750_v6 }
 0x10b   : > { %vm516_vm4 = vcmp.eq.s32.totalorder %v1918_v61, %v486_v51  ;;  %vm329_vm5 = vcmp.eq.s32.totalorder %v1918_v61, %v309_v25  ;;  %568 = vadd.xlane.f32.xlu0 %v546_v42  ;;  %574 = vadd.xlane.f32.xlu1 %v549_v26  ;;  %v455_v23 = vadd.f32 %v439_v32, %v359_v33  ;;  %v2192_v1 = vadd.s32 4294967168, %v1758_v8  ;;  %v3087_v25 = vld [vmem:[#allocation6_spill] sm:$0xff] }
 0x10c   : > { %v345_v21 = vsel %vm329_vm5, %v1927_v17, 0.0  ;;  %v532_v45 = vsel %vm516_vm4, %v1927_v17, 0.0  ;;  %v2196_v34 = vadd.s32 4294967168, %v1766_v10  ;;  %v2200_v4 = vadd.s32 4294967168, %v1774_v12 }
 0x10d   : > { %v361_v36 = vadd.f32 %v345_v21, %v2003_v38  ;;  %v548_v41 = vadd.f32 %v532_v45, %v452_v60  ;;  %v551_v29 = vadd.f32 %v535_v31, %v455_v23  ;;  %v250_v38 = vsel %vm228_vm13, %v1927_v17, 0.0 }
 0x10e   : > { %v492_v39 = vpop.permute.xlu1 %491  ;;  %v362_v22 = vadd.f32 %v346_v56, %v250_v38  ;;  %v2204_v6 = vadd.s32 4294967168, %v1782_v14  ;;  %v2208_v8 = vadd.s32 4294967168, %v1790_v16  ;;  %v2212_v10 = vadd.s32 4294967168, %v1734_v2  ;;  %v3079_v2 = vld [vmem:[#allocation3_spill] sm:$0xff] }
 0x10f   : > { %vm518_vm8 = vcmp.eq.s32.totalorder %v1918_v61, %v492_v39  ;;  %572 = vadd.xlane.f32.xlu0 %v548_v41  ;;  %578 = vadd.xlane.f32.xlu1 %v551_v29  ;;  %v457_v50 = vadd.f32 %v441_v30, %v361_v36  ;;  %v3078_v20 = vmov 2   ;;  %v2217_v12 = vadd.s32 4294967168, %v1739_v3 }
 0x110   : > { %v534_v19 = vsel %vm518_vm8, %v1927_v17, 0.0  ;;  %v458_v43 = vadd.f32 %v442_v13, %v362_v22  ;;  %v2221_v14 = vadd.s32 4294967168, %v1747_v5  ;;  %v2225_v16 = vadd.s32 4294967168, %v1755_v7 }
 0x111   : > { %v550_v27 = vadd.f32 %v534_v19, %v454_v44  ;;  %v553_v58 = vadd.f32 %v537_v48, %v457_v50  ;;  %v2229_v46 = vadd.s32 4294967168, %v3079_v2  ;;  %v2233_v3 = vadd.s32 4294967168, %v3080_v37 }
 0x112   : > { %v498_v62 = vpop.permute.xlu1 %497  ;;  %v2237_v5 = vadd.s32 4294967168, %v3081_v0  ;;  %v2241_v7 = vadd.s32 4294967168, %v1787_v15  ;;  %v3082_v54 = vmov 3   ;;  %v3083_v28 = vmov 0  }
 0x113   : > { %vm520_vm10 = vcmp.eq.s32.totalorder %v1918_v61, %v498_v62  ;;  %576 = vadd.xlane.f32.xlu0 %v550_v27  ;;  %582 = vadd.xlane.f32.xlu1 %v553_v58  ;;  %vm229_vm13 = vcmp.eq.s32.totalorder %v1918_v61, %v3087_v25  ;;  %vm427_vm11 = vcmp.eq.s32.totalorder %v1918_v61, %v2008_v9  ;;  %v3089_v9 = vld [vmem:[#allocation2_spill] sm:$0xff] }
 0x114   : > { %v536_v47 = vsel %vm520_vm10, %v1927_v17, 0.0  ;;  %v251_v55 = vsel %vm229_vm13, %v1927_v17, 0.0  ;;  %vm523_vm15 = vcmp.eq.s32.totalorder %v1918_v61, %v3088_v63  ;;  %v443_v45 = vsel %vm427_vm11, %v1927_v17, 0.0 }
 0x115   : > { %v552_v24 = vadd.f32 %v536_v47, %v456_v35  ;;  %v539_v41 = vsel %vm523_vm15, %v1927_v17, 0.0  ;;  %v1599_v30 = vadd.s32 4294967168, %v3089_v9 }
 0x116   : > { %v504_v57 = vpop.permute.xlu1 %503 }
 0x117   : > { %vm522_vm12 = vcmp.eq.s32.totalorder %v1918_v61, %v504_v57  ;;  %580 = vadd.xlane.f32.xlu0 %v552_v24 }
 0x118   : > { %v538_v49 = vsel %vm522_vm12, %v1927_v17, 0.0 }
 0x119   : > { %v554_v53 = vadd.f32 %v538_v49, %v458_v43 }
 0x11b   : > { %584 = vadd.xlane.f32.xlu0 %v554_v53 }
 0x131   : > { %314 = vperm.xlu0 %1652, %v1787_v15  }
 0x135   : > { %727 = vperm.xlu0 %1652, %v2184_v52  }
 0x139   : > { %736 = vperm.xlu0 %1652, %v2188_v59  }
 0x13d   : > { %742 = vperm.xlu0 %1652, %v2192_v1  }
 0x141   : > { %748 = vperm.xlu0 %1652, %v2196_v34  }
 0x145   : > { %754 = vperm.xlu0 %1652, %v2200_v4  }
 0x149   : > { %760 = vperm.xlu0 %1652, %v2204_v6  }
 0x14d   : > { %766 = vperm.xlu0 %1652, %v2208_v8  }
 0x151   : > { %1655 = vset.pattern.permute.xlu0 %v3078_v20 }
 0x152   : > { %820 = vperm.xlu0 %1655, %v2212_v10  }
 0x156   : > { %829 = vperm.xlu0 %1655, %v2217_v12  }
 0x15a   : > { %835 = vperm.xlu0 %1655, %v2221_v14  }
 0x15e   : > { %841 = vperm.xlu0 %1655, %v2225_v16  }
 0x162   : > { %847 = vperm.xlu0 %1655, %v2229_v46  }
 0x166   : > { %853 = vperm.xlu0 %1655, %v2233_v3  }
 0x16a   : > { %859 = vperm.xlu0 %1655, %v2237_v5  }
 0x16e   : > { %865 = vperm.xlu0 %1655, %v2241_v7  }
 0x172   : > { %1658 = vset.pattern.permute.xlu0 %v3082_v54 }
 0x173   : > { %919 = vperm.xlu0 %1658, %v2184_v52  }
 0x177   : > { %928 = vperm.xlu0 %1658, %v2188_v59  }
 0x17b   : > { %934 = vperm.xlu0 %1658, %v2192_v1  }
 0x17f   : > { %940 = vperm.xlu0 %1658, %v2196_v34  }
 0x183   : > { %946 = vperm.xlu0 %1658, %v2200_v4  }
 0x187   : > { %952 = vperm.xlu0 %1658, %v2204_v6  }
 0x188   : > { %v2307_v39 = vpop.xlane.xlu1 %556 }
 0x18b   : > { %958 = vperm.xlu0 %1658, %v2208_v8  }
 0x18c   : > { %v2252_v15 = vpop.xlane.xlu0 %558  ;;  %v2309_v44 = vpop.xlane.xlu1 %562 }
 0x18f   : > { %1659 = vset.pattern.permute.xlu0 %v3083_v28 }
 0x190   : > { %v2255_v18 = vpop.xlane.xlu0 %560  ;;  %622 = vperm.xlu0 %1659, %v2212_v10   ;;  %v2313_v48 = vpop.xlane.xlu1 %566 }
 0x194   : > { %v2258_v60 = vpop.xlane.xlu0 %564  ;;  %649 = vperm.xlu0 %1659, %v2229_v46   ;;  %v2318_v50 = vpop.xlane.xlu1 %570 }
 0x198   : > { %v2261_v33 = vpop.xlane.xlu0 %568  ;;  %655 = vperm.xlu0 %1659, %v2233_v3   ;;  %v2324_v40 = vpop.xlane.xlu1 %574 }
 0x19c   : > { %v2264_v42 = vpop.xlane.xlu0 %572  ;;  %661 = vperm.xlu0 %1659, %v2237_v5   ;;  %v2329_v19 = vpop.xlane.xlu1 %578 }
 0x19d   : > { %3091 = vst [vmem:[#allocation6_spill] sm:$0xff] %v2329_v19 }
 0x1a0   : > { %v2267_v26 = vpop.xlane.xlu0 %576  ;;  %667 = vperm.xlu0 %1659, %v2241_v7   ;;  %v2335_v58 = vpop.xlane.xlu1 %582 }
 0x1a1   : > { %3084 = vst [vmem:[#allocation3_spill] sm:$0xff] %v2267_v26  ;;  %3092 = vst [vmem:[#allocation7_spill] sm:$0xff] %v2335_v58 }
 0x1a4   : > { %v2270_v32 = vpop.xlane.xlu0 %580 }
 0x1a5   : > { %3085 = vst [vmem:[#allocation4_spill] sm:$0xff] %v2270_v32 }
 0x1a8   : > { %v2272_v51 = vpop.xlane.xlu0 %584 }
 0x1a9   : > { %3086 = vst [vmem:[#allocation5_spill] sm:$0xff] %v2272_v51 }
 0x1b0   : > { %v315_v31 = vpop.permute.xlu0 %314 }
 0x1b1   : > { %vm331_vm14 = vcmp.eq.s32.totalorder %v1918_v61, %v315_v31 }
 0x1b2   : > { %v347_v23 = vsel %vm331_vm14, %v1927_v17, 0.0  ;;  %v3090_v17 = vmov 1  }
 0x1b3   : > { %v363_v21 = vadd.f32 %v347_v23, %v251_v55 }
 0x1b4   : > { %v2316_v11 = vpop.permute.xlu0 %727 }
 0x1b5   : > { %v459_v36 = vadd.f32 %v443_v45, %v363_v21  ;;  %v2405_v45 = vld [vmem:[%s3058_s1 + $0x1] ss:$0 sm:$0xff]  ;;  %vm772_vm2 = vcmp.eq.s32.totalorder %v1918_v61, %v2316_v11 }
 0x1b7   : > { %v555_v29 = vadd.f32 %v539_v41, %v459_v36 }
 0x1b8   : > { %v2321_v38 = vpop.permute.xlu0 %736 }
 0x1b9   : > { %586 = vadd.xlane.f32.xlu1 %v555_v29  ;;  %v788_v29 = vsel %vm772_vm2, %v2405_v45, 0.0  ;;  %vm775_vm5 = vcmp.eq.s32.totalorder %v1918_v61, %v2321_v38 }
 0x1bc   : > { %v2327_v56 = vpop.permute.xlu0 %742 }
 0x1bd   : > { %vm777_vm6 = vcmp.eq.s32.totalorder %v1918_v61, %v2327_v56 }
 0x1c0   : > { %v2333_v27 = vpop.permute.xlu0 %748 }
 0x1c1   : > { %vm779_vm12 = vcmp.eq.s32.totalorder %v1918_v61, %v2333_v27 }
 0x1c2   : > { %v795_v27 = vsel %vm779_vm12, %v2405_v45, 0.0 }
 0x1c4   : > { %v2338_v62 = vpop.permute.xlu0 %754 }
 0x1c5   : > { %vm781_vm15 = vcmp.eq.s32.totalorder %v1918_v61, %v2338_v62 }
 0x1c6   : > { %v797_v62 = vsel %vm781_vm15, %v2405_v45, 0.0 }
 0x1c8   : > { %v2343_v13 = vpop.permute.xlu0 %760 }
 0x1ca   : > { %625 = vperm.xlu1 %1653, %v2184_v52  }
 0x1cc   : > { %v2349_v24 = vpop.permute.xlu0 %766 }
 0x1ce   : > { %628 = vperm.xlu1 %1653, %v1599_v30  }
 0x1d1   : > { %v2354_v43 = vpop.permute.xlu0 %820 }
 0x1d2   : > { %631 = vperm.xlu1 %1653, %v2217_v12  }
 0x1d6   : > { %634 = vperm.xlu1 %1653, %v2188_v59  }
 0x1da   : > { %637 = vperm.xlu1 %1653, %v2221_v14  }
 0x1de   : > { %640 = vperm.xlu1 %1653, %v2192_v1  }
 0x1e2   : > { %643 = vperm.xlu1 %1653, %v2225_v16  }
 0x1e6   : > { %646 = vperm.xlu1 %1653, %v2196_v34  }
 0x1ea   : > { %652 = vperm.xlu1 %1653, %v2200_v4  }
 0x1ee   : > { %658 = vperm.xlu1 %1653, %v2204_v6  }
 0x1f2   : > { %664 = vperm.xlu1 %1653, %v2208_v8  }
 0x1f6   : > { %1654 = vset.pattern.permute.xlu1 %v3090_v17 }
 0x1f7   : > { %724 = vperm.xlu1 %1654, %v2212_v10  }
 0x1fb   : > { %730 = vperm.xlu1 %1654, %v1599_v30  }
 0x1ff   : > { %733 = vperm.xlu1 %1654, %v2217_v12  }
 0x203   : > { %739 = vperm.xlu1 %1654, %v2221_v14  }
 0x207   : > { %745 = vperm.xlu1 %1654, %v2225_v16  }
 0x20b   : > { %751 = vperm.xlu1 %1654, %v2229_v46  }
 0x20f   : > { %757 = vperm.xlu1 %1654, %v2233_v3  }
 0x213   : > { %763 = vperm.xlu1 %1654, %v2237_v5  }
 0x217   : > { %769 = vperm.xlu1 %1654, %v2241_v7  }
 0x21b   : > { %1656 = vset.pattern.permute.xlu1 %v3078_v20 }
 0x21c   : > { %823 = vperm.xlu1 %1656, %v2184_v52   ;;  %v2359_v52 = vpop.permute.xlu0 %829 }
 0x220   : > { %826 = vperm.xlu1 %1656, %v1599_v30  }
 0x224   : > { %832 = vperm.xlu1 %1656, %v2188_v59  }
 0x228   : > { %838 = vperm.xlu1 %1656, %v2192_v1   ;;  %v2363_v1 = vpop.permute.xlu0 %835 }
 0x22c   : > { %844 = vperm.xlu1 %1656, %v2196_v34  }
 0x230   : > { %850 = vperm.xlu1 %1656, %v2200_v4  }
 0x234   : > { %856 = vperm.xlu1 %1656, %v2204_v6   ;;  %v2367_v6 = vpop.permute.xlu0 %841 }
 0x238   : > { %862 = vperm.xlu1 %1656, %v2208_v8  }
 0x23c   : > { %1657 = vset.pattern.permute.xlu1 %v3082_v54 }
 0x23d   : > { %916 = vperm.xlu1 %1657, %v2212_v10   ;;  %v2371_v10 = vpop.permute.xlu0 %847 }
 0x241   : > { %922 = vperm.xlu1 %1657, %v1599_v30  }
 0x245   : > { %925 = vperm.xlu1 %1657, %v2217_v12  }
 0x246   : > { %v2340_v22 = vpop.xlane.xlu1 %586 }
 0x247   : > { %3093 = vst [vmem:[#allocation2_spill] sm:$0xff] %v2340_v22 }
 0x249   : > { %931 = vperm.xlu1 %1657, %v2221_v14  }
 0x24a   : > { %v626_v35 = vpop.permute.xlu1 %625 }
 0x24b   : > { %vm670_vm1 = vcmp.eq.s32.totalorder %v1918_v61, %v626_v35 }
 0x24c   : > { %v692_v41 = vsel %vm670_vm1, %v2405_v45, 0.0 }
 0x24d   : > { %937 = vperm.xlu1 %1657, %v2225_v16   ;;  %v2377_v16 = vpop.permute.xlu0 %853  ;;  %v804_v30 = vadd.f32 %v788_v29, %v692_v41 }
 0x24e   : > { %v2346_v47 = vpop.permute.xlu1 %628 }
 0x251   : > { %943 = vperm.xlu1 %1657, %v2229_v46   ;;  %v2381_v46 = vpop.permute.xlu0 %859 }
 0x252   : > { %v2351_v57 = vpop.permute.xlu1 %631 }
 0x255   : > { %949 = vperm.xlu1 %1657, %v2233_v3   ;;  %v2387_v0 = vpop.permute.xlu0 %865 }
 0x256   : > { %v635_v49 = vpop.permute.xlu1 %634 }
 0x257   : > { %vm673_vm4 = vcmp.eq.s32.totalorder %v1918_v61, %v635_v49 }
 0x258   : > { %v695_v41 = vsel %vm673_vm4, %v2405_v45, 0.0 }
 0x259   : > { %955 = vperm.xlu1 %1657, %v2237_v5  }
 0x25a   : > { %v2357_v53 = vpop.permute.xlu1 %637 }
 0x25d   : > { %961 = vperm.xlu1 %1657, %v2241_v7   ;;  %v920_v7 = vpop.permute.xlu0 %919 }
 0x25e   : > { %v641_v59 = vpop.permute.xlu1 %640  ;;  %vm964_vm0 = vcmp.eq.s32.totalorder %v1918_v61, %v920_v7  ;;  %v791_v7 = vsel %vm775_vm5, %v2405_v45, 0.0 }
 0x25f   : > { %v980_v11 = vsel %vm964_vm0, %v2405_v45, 0.0  ;;  %vm675_vm7 = vcmp.eq.s32.totalorder %v1918_v61, %v641_v59  ;;  %v807_v49 = vadd.f32 %v791_v7, %v695_v41  ;;  %v793_v59 = vsel %vm777_vm6, %v2405_v45, 0.0 }
 0x260   : > { %vm785_vm6 = vcmp.eq.s32.totalorder %v1918_v61, %v2349_v24 }
 0x261   : > { %1660 = vset.pattern.permute.xlu1 %v3083_v28  ;;  %v929_v31 = vpop.permute.xlu0 %928 }
 0x262   : > { %v2365_v34 = vpop.permute.xlu1 %643  ;;  %vm967_vm8 = vcmp.eq.s32.totalorder %v1918_v61, %v929_v31 }
 0x263   : > { %v983_v56 = vsel %vm967_vm8, %v2405_v45, 0.0 }
 0x265   : > { %v935_v23 = vpop.permute.xlu0 %934 }
 0x266   : > { %v647_v4 = vpop.permute.xlu1 %646  ;;  %vm969_vm13 = vcmp.eq.s32.totalorder %v1918_v61, %v935_v23 }
 0x267   : > { %vm677_vm10 = vcmp.eq.s32.totalorder %v1918_v61, %v647_v4  ;;  %v985_v23 = vsel %vm969_vm13, %v2405_v45, 0.0  ;;  %vm867_vm13 = vcmp.eq.s32.totalorder %v1918_v61, %v2354_v43 }
 0x269   : > { %v941_v36 = vpop.permute.xlu0 %940 }
 0x26a   : > { %v2369_v8 = vpop.permute.xlu1 %652  ;;  %vm971_vm1 = vcmp.eq.s32.totalorder %v1918_v61, %v941_v36 }
 0x26b   : > { %vm679_vm14 = vcmp.eq.s32.totalorder %v1918_v61, %v2369_v8 }
 0x26d   : > { %v2415_v22 = vpop.permute.xlu0 %946 }
 0x26e   : > { %v2373_v12 = vpop.permute.xlu1 %658  ;;  %vm973_vm4 = vcmp.eq.s32.totalorder %v1918_v61, %v2415_v22 }
 0x26f   : > { %vm681_vm0 = vcmp.eq.s32.totalorder %v1918_v61, %v2373_v12  ;;  %v989_v22 = vsel %vm973_vm4, %v2405_v45, 0.0 }
 0x270   : > { %v703_v12 = vsel %vm681_vm0, %v2405_v45, 0.0 }
 0x272   : > { %v2375_v14 = vpop.permute.xlu1 %664 }
 0x276   : > { %v2379_v2 = vpop.permute.xlu1 %724 }
 0x27a   : > { %v2383_v37 = vpop.permute.xlu1 %730 }
 0x27b   : > { %vm773_vm15 = vcmp.eq.s32.totalorder %v1918_v61, %v2383_v37 }
 0x27e   : > { %v2385_v3 = vpop.permute.xlu1 %733 }
 0x282   : > { %v2389_v5 = vpop.permute.xlu1 %739 }
 0x286   : > { %v2391_v28 = vpop.permute.xlu1 %745 }
 0x28a   : > { %v2393_v25 = vpop.permute.xlu1 %751 }
 0x28e   : > { %v2395_v55 = vpop.permute.xlu1 %757 }
 0x292   : > { %v2397_v63 = vpop.permute.xlu1 %763 }
 0x296   : > { %v2400_v21 = vpop.permute.xlu1 %769 }
 0x29b   : > { %v824_v9 = vpop.permute.xlu1 %823 }
 0x29c   : > { %vm868_vm3 = vcmp.eq.s32.totalorder %v1918_v61, %v824_v9  ;;  %v2428_v9 = vpop.permute.xlu0 %952 }
 0x29d   : > { %v884_v35 = vsel %vm868_vm3, %v2405_v45, 0.0  ;;  %vm783_vm3 = vcmp.eq.s32.totalorder %v1918_v61, %v2343_v13 }
 0x29e   : > { %v900_v51 = vadd.f32 %v884_v35, %v804_v30 }
 0x29f   : > { %v2418_v58 = vpop.permute.xlu1 %826 }
 0x2a0   : > { %v996_v32 = vadd.f32 %v980_v11, %v900_v51  ;;  %v697_v51 = vsel %vm675_vm7, %v2405_v45, 0.0  ;;  %v699_v11 = vsel %vm677_vm10, %v2405_v45, 0.0  ;;  %v959_v4 = vpop.permute.xlu0 %958  ;;  %vm683_vm7 = vcmp.eq.s32.totalorder %v1918_v61, %v2375_v14 }
 0x2a1   : > { %v809_v31 = vadd.f32 %v793_v59, %v697_v51  ;;  %v987_v59 = vsel %vm971_vm1, %v2405_v45, 0.0  ;;  %vm975_vm10 = vcmp.eq.s32.totalorder %v1918_v61, %v2428_v9  ;;  %vm671_vm1 = vcmp.eq.s32.totalorder %v1918_v61, %v2346_v47 }
 0x2a2   : > { %1013 = vadd.xlane.f32.xlu1 %v996_v32  ;;  %v991_v9 = vsel %vm975_vm10, %v2405_v45, 0.0  ;;  %vm869_vm0 = vcmp.eq.s32.totalorder %v1918_v61, %v2418_v58  ;;  %v693_v47 = vsel %vm671_vm1, %v2405_v45, 0.0  ;;  %vm872_vm10 = vcmp.eq.s32.totalorder %v1918_v61, %v2363_v1 }
 0x2a3   : > { %v833_v29 = vpop.permute.xlu1 %832 }
 0x2a4   : > { %vm871_vm9 = vcmp.eq.s32.totalorder %v1918_v61, %v833_v29 }
 0x2a5   : > { %v887_v38 = vsel %vm871_vm9, %v2405_v45, 0.0  ;;  %vm771_vm9 = vcmp.eq.s32.totalorder %v1918_v61, %v2379_v2  ;;  %v801_v2 = vsel %vm785_vm6, %v2405_v45, 0.0  ;;  %vm674_vm6 = vcmp.eq.s32.totalorder %v1918_v61, %v2357_v53 }
 0x2a6   : > { %v903_v32 = vadd.f32 %v887_v38, %v807_v49  ;;  %v811_v49 = vadd.f32 %v795_v27, %v699_v11  ;;  %v701_v38 = vsel %vm679_vm14, %v2405_v45, 0.0  ;;  %v799_v11 = vsel %vm783_vm3, %v2405_v45, 0.0 }
 0x2a7   : > { %v839_v30 = vpop.permute.xlu1 %838  ;;  %v705_v27 = vsel %vm683_vm7, %v2405_v45, 0.0  ;;  %vm672_vm3 = vcmp.eq.s32.totalorder %v1918_v61, %v2351_v57  ;;  %vm870_vm7 = vcmp.eq.s32.totalorder %v1918_v61, %v2359_v52  ;;  %v696_v53 = vsel %vm674_vm6, %v2405_v45, 0.0 }
 0x2a8   : > { %vm873_vm11 = vcmp.eq.s32.totalorder %v1918_v61, %v839_v30  ;;  %v999_v35 = vadd.f32 %v983_v56, %v903_v32  ;;  %v813_v56 = vadd.f32 %v797_v62, %v701_v38  ;;  %v623_v30 = vpop.permute.xlu0 %622  ;;  %v817_v38 = vadd.f32 %v801_v2, %v705_v27 }
 0x2a9   : > { %v889_v41 = vsel %vm873_vm11, %v2405_v45, 0.0  ;;  %vm669_vm8 = vcmp.eq.s32.totalorder %v1918_v61, %v623_v30  ;;  %vm977_vm11 = vcmp.eq.s32.totalorder %v1918_v61, %v959_v4  ;;  %v789_v4 = vsel %vm773_vm15, %v2405_v45, 0.0 }
 0x2aa   : > { %v905_v7 = vadd.f32 %v889_v41, %v809_v31  ;;  %1019 = vadd.xlane.f32.xlu1 %v999_v35  ;;  %v691_v24 = vsel %vm669_vm8, %v2405_v45, 0.0  ;;  %v993_v43 = vsel %vm977_vm11, %v2405_v45, 0.0  ;;  %v805_v58 = vadd.f32 %v789_v4, %v693_v47 }
 0x2ab   : > { %v845_v29 = vpop.permute.xlu1 %844  ;;  %v694_v57 = vsel %vm672_vm3, %v2405_v45, 0.0  ;;  %v886_v52 = vsel %vm870_vm7, %v2405_v45, 0.0  ;;  %v888_v2 = vsel %vm872_vm10, %v2405_v45, 0.0  ;;  %vm874_vm15 = vcmp.eq.s32.totalorder %v1918_v61, %v2367_v6 }
 0x2ac   : > { %vm875_vm2 = vcmp.eq.s32.totalorder %v1918_v61, %v845_v29  ;;  %v1001_v51 = vadd.f32 %v985_v23, %v905_v7  ;;  %v815_v7 = vadd.f32 %v799_v11, %v703_v12  ;;  %v787_v29 = vsel %vm771_vm9, %v2405_v45, 0.0  ;;  %v650_v12 = vpop.permute.xlu0 %649 }
 0x2ad   : > { %v891_v8 = vsel %vm875_vm2, %v2405_v45, 0.0  ;;  %vm774_vm2 = vcmp.eq.s32.totalorder %v1918_v61, %v2385_v3  ;;  %v885_v3 = vsel %vm869_vm0, %v2405_v45, 0.0  ;;  %vm778_vm9 = vcmp.eq.s32.totalorder %v1918_v61, %v2391_v28 }
 0x2ae   : > { %v907_v32 = vadd.f32 %v891_v8, %v811_v49  ;;  %1023 = vadd.xlane.f32.xlu1 %v1001_v51  ;;  %v794_v28 = vsel %vm778_vm9, %v2405_v45, 0.0  ;;  %vm678_vm11 = vcmp.eq.s32.totalorder %v1918_v61, %v650_v12  ;;  %vm782_vm0 = vcmp.eq.s32.totalorder %v1918_v61, %v2395_v55 }
 0x2af   : > { %v851_v36 = vpop.permute.xlu1 %850  ;;  %vm876_vm3 = vcmp.eq.s32.totalorder %v1918_v61, %v2371_v10  ;;  %v798_v55 = vsel %vm782_vm0, %v2405_v45, 0.0  ;;  %vm784_vm7 = vcmp.eq.s32.totalorder %v1918_v61, %v2397_v63  ;;  %v1668_v10 = vld [vmem:[%s1728_s15 + $0x10] sm:$0xff]  ;;  %vm878_vm6 = vcmp.eq.s32.totalorder %v1918_v61, %v2377_v16  ;;  %v1669_v16 = vld [vmem:[%s1728_s15 + $0x18] sm:$0xff] }
 0x2b0   : > { %vm877_vm5 = vcmp.eq.s32.totalorder %v1918_v61, %v851_v36  ;;  %v1003_v31 = vadd.f32 %v987_v59, %v907_v32  ;;  %v803_v32 = vadd.f32 %v787_v29, %v691_v24  ;;  %v883_v59 = vsel %vm867_vm13, %v2405_v45, 0.0  ;;  %v656_v27 = vpop.permute.xlu0 %655 }
 0x2b1   : > { %v893_v35 = vsel %vm877_vm5, %v2405_v45, 0.0  ;;  %vm776_vm5 = vcmp.eq.s32.totalorder %v1918_v61, %v2389_v5  ;;  %v2554_v12 = vadd.s32 4294967040, %v1668_v10  ;;  %vm786_vm10 = vcmp.eq.s32.totalorder %v1918_v61, %v2400_v21 }
 0x2b2   : > { %v909_v13 = vadd.f32 %v893_v35, %v813_v56  ;;  %1027 = vadd.xlane.f32.xlu1 %v1003_v31  ;;  %v899_v30 = vadd.f32 %v883_v59, %v803_v32  ;;  %v790_v31 = vsel %vm774_vm2, %v2405_v45, 0.0  ;;  %vm680_vm2 = vcmp.eq.s32.totalorder %v1918_v61, %v656_v27 }
 0x2b3   : > { %v857_v41 = vpop.permute.xlu1 %856  ;;  %v802_v27 = vsel %vm786_vm10, %v2405_v45, 0.0 }
 0x2b4   : > { %vm879_vm12 = vcmp.eq.s32.totalorder %v1918_v61, %v857_v41  ;;  %v1005_v14 = vadd.f32 %v989_v22, %v909_v13  ;;  %v806_v22 = vadd.f32 %v790_v31, %v694_v57  ;;  %v901_v41 = vadd.f32 %v885_v3, %v805_v58 }
 0x2b5   : > { %v895_v23 = vsel %vm879_vm12, %v2405_v45, 0.0  ;;  %vm676_vm12 = vcmp.eq.s32.totalorder %v1918_v61, %v2365_v34  ;;  %v892_v3 = vsel %vm876_vm3, %v2405_v45, 0.0 }
 0x2b6   : > { %v911_v49 = vadd.f32 %v895_v23, %v815_v7  ;;  %1031 = vadd.xlane.f32.xlu1 %v1005_v14  ;;  %v792_v7 = vsel %vm776_vm5, %v2405_v45, 0.0  ;;  %v902_v29 = vadd.f32 %v886_v52, %v806_v22  ;;  %v698_v34 = vsel %vm676_vm12, %v2405_v45, 0.0 }
 0x2b7   : > { %v863_v51 = vpop.permute.xlu1 %862  ;;  %v808_v24 = vadd.f32 %v792_v7, %v696_v53  ;;  %v2568_v7 = vadd.s32 4294967040, %v1669_v16  ;;  %vm880_vm12 = vcmp.eq.s32.totalorder %v1918_v61, %v2381_v46 }
 0x2b8   : > { %vm881_vm14 = vcmp.eq.s32.totalorder %v1918_v61, %v863_v51  ;;  %v1007_v8 = vadd.f32 %v991_v9, %v911_v49  ;;  %v810_v51 = vadd.f32 %v794_v28, %v698_v34  ;;  %v896_v46 = vsel %vm880_vm12, %v2405_v45, 0.0 }
 0x2b9   : > { %v897_v62 = vsel %vm881_vm14, %v2405_v45, 0.0  ;;  %vm780_vm14 = vcmp.eq.s32.totalorder %v1918_v61, %v2393_v25  ;;  %v662_v25 = vpop.permute.xlu0 %661 }
 0x2ba   : > { %v913_v36 = vadd.f32 %v897_v62, %v817_v38  ;;  %1035 = vadd.xlane.f32.xlu1 %v1007_v8  ;;  %v904_v38 = vadd.f32 %v888_v2, %v808_v24  ;;  %v700_v8 = vsel %vm678_vm11, %v2405_v45, 0.0  ;;  %v796_v32 = vsel %vm780_vm14, %v2405_v45, 0.0 }
 0x2bb   : > { %vm682_vm5 = vcmp.eq.s32.totalorder %v1918_v61, %v662_v25  ;;  %vm882_vm11 = vcmp.eq.s32.totalorder %v1918_v61, %v2387_v0 }
 0x2bc   : > { %v917_v37 = vpop.permute.xlu1 %916  ;;  %v1009_v56 = vadd.f32 %v993_v43, %v913_v36  ;;  %v1667_v36 = vld [vmem:[%s1728_s15] sm:$0xff]  ;;  %v890_v43 = vsel %vm874_vm15, %v2405_v45, 0.0  ;;  %v704_v63 = vsel %vm682_vm5, %v2405_v45, 0.0 }
 0x2bd   : > { %vm963_vm4 = vcmp.eq.s32.totalorder %v1918_v61, %v917_v37  ;;  %v2540_v6 = vadd.s32 4294967040, %v1667_v36  ;;  %v812_v37 = vadd.f32 %v796_v32, %v700_v8  ;;  %v898_v8 = vsel %vm882_vm11, %v2405_v45, 0.0 }
 0x2be   : > { %v979_v35 = vsel %vm963_vm4, %v2405_v45, 0.0  ;;  %1039 = vadd.xlane.f32.xlu1 %v1009_v56  ;;  %v906_v56 = vadd.f32 %v890_v43, %v810_v51  ;;  %v1671_v51 = vld [vmem:[%s1728_s15 + $0x28] sm:$0xff]  ;;  %v1673_v43 = vld [vmem:[%s1728_s15 + $0x38] sm:$0xff] }
 0x2bf   : > { %v995_v11 = vadd.f32 %v979_v35, %v899_v30  ;;  %v702_v30 = vsel %vm680_vm2, %v2405_v45, 0.0  ;;  %v668_v35 = vpop.permute.xlu0 %667  ;;  %v908_v57 = vadd.f32 %v892_v3, %v812_v37  ;;  %v1674_v37 = vld [vmem:[%s1728_s15 + $0x40] sm:$0xff]  ;;  %v1678_v3 = vld [vmem:[%s1728_s15 + $0x8] sm:$0xff] }
 0x2c0   : > { %v923_v13 = vpop.permute.xlu1 %922  ;;  %vm684_vm9 = vcmp.eq.s32.totalorder %v1918_v61, %v668_v35  ;;  %v1615_v35 = vadd.s32 4294967040, %v1678_v3 }
 0x2c1   : > { %vm965_vm8 = vcmp.eq.s32.totalorder %v1918_v61, %v923_v13  ;;  %1011 = vadd.xlane.f32.xlu0 %v995_v11  ;;  %v814_v11 = vadd.f32 %v798_v55, %v702_v30  ;;  %v800_v13 = vsel %vm784_vm7, %v2405_v45, 0.0  ;;  %v706_v21 = vsel %vm684_vm9, %v2405_v45, 0.0  ;;  %v1676_v55 = vld [vmem:[%s1728_s15 + $0x60] sm:$0xff] }
 0x2c2   : > { %v981_v14 = vsel %vm965_vm8, %v2405_v45, 0.0  ;;  %v816_v52 = vadd.f32 %v800_v13, %v704_v63  ;;  %v1681_v13 = vld [vmem:[%s1728_s15 + $0x68] sm:$0xff] }
 0x2c3   : > { %v997_v5 = vadd.f32 %v981_v14, %v901_v41  ;;  %v894_v14 = vsel %vm878_vm6, %v2405_v45, 0.0 }
 0x2c4   : > { %v926_v23 = vpop.permute.xlu1 %925  ;;  %v910_v53 = vadd.f32 %v894_v14, %v814_v11  ;;  %v912_v2 = vadd.f32 %v896_v46, %v816_v52 }
 0x2c5   : > { %vm966_vm13 = vcmp.eq.s32.totalorder %v1918_v61, %v926_v23  ;;  %1015 = vadd.xlane.f32.xlu0 %v997_v5 }
 0x2c6   : > { %v982_v49 = vsel %vm966_vm13, %v2405_v45, 0.0 }
 0x2c7   : > { %v998_v1 = vadd.f32 %v982_v49, %v902_v29  ;;  %v1670_v29 = vld [vmem:[%s1728_s15 + $0x20] sm:$0xff] }
 0x2c8   : > { %v932_v9 = vpop.permute.xlu1 %931  ;;  %v2579_v28 = vadd.s32 4294967040, %v1670_v29 }
 0x2c9   : > { %vm968_vm1 = vcmp.eq.s32.totalorder %v1918_v61, %v932_v9  ;;  %1017 = vadd.xlane.f32.xlu0 %v998_v1  ;;  %v818_v1 = vadd.f32 %v802_v27, %v706_v21 }
 0x2ca   : > { %v984_v62 = vsel %vm968_vm1, %v2405_v45, 0.0 }
 0x2cb   : > { %v1000_v59 = vadd.f32 %v984_v62, %v904_v38  ;;  %v2588_v38 = vadd.s32 4294967040, %v1671_v51  ;;  %v914_v0 = vadd.f32 %v898_v8, %v818_v1 }
 0x2cc   : > { %v938_v4 = vpop.permute.xlu1 %937 }
 0x2cd   : > { %vm970_vm4 = vcmp.eq.s32.totalorder %v1918_v61, %v938_v4  ;;  %1021 = vadd.xlane.f32.xlu0 %v1000_v59  ;;  %v1672_v59 = vld [vmem:[%s1728_s15 + $0x30] sm:$0xff]  ;;  %v2599_v4 = vadd.s32 4294967040, %v1673_v43 }
 0x2ce   : > { %v986_v47 = vsel %vm970_vm4, %v2405_v45, 0.0  ;;  %v2595_v36 = vadd.s32 4294967040, %v1672_v59 }
 0x2cf   : > { %v1002_v31 = vadd.f32 %v986_v47, %v906_v56  ;;  %1077 = vperm.xlu1 %1660, %v2540_v6   ;;  %v1675_v56 = vld [vmem:[%s1728_s15 + $0x50] sm:$0xff]  ;;  %v2611_v47 = vadd.s32 4294967040, %v1676_v55 }
 0x2d0   : > { %v944_v58 = vpop.permute.xlu1 %943  ;;  %v2607_v30 = vadd.s32 4294967040, %v1675_v56 }
 0x2d1   : > { %vm972_vm8 = vcmp.eq.s32.totalorder %v1918_v61, %v944_v58  ;;  %1025 = vadd.xlane.f32.xlu0 %v1002_v31  ;;  %v1677_v31 = vld [vmem:[%s1728_s15 + $0x70] sm:$0xff]  ;;  %v1679_v58 = vld [vmem:[%s1728_s15 + $0x48] sm:$0xff] }
 0x2d2   : > { %v988_v22 = vsel %vm972_vm8, %v2405_v45, 0.0  ;;  %v2615_v10 = vadd.s32 4294967040, %v1677_v31  ;;  %v2620_v11 = vadd.s32 4294967040, %v1679_v58 }
 0x2d3   : > { %v1004_v41 = vadd.f32 %v988_v22, %v908_v57  ;;  %1083 = vperm.xlu1 %1660, %v2554_v12   ;;  %v1680_v57 = vld [vmem:[%s1728_s15 + $0x58] sm:$0xff]  ;;  %v2630_v22 = vadd.s32 4294967040, %v1681_v13 }
 0x2d4   : > { %v950_v5 = vpop.permute.xlu1 %949  ;;  %v2625_v63 = vadd.s32 4294967040, %v1680_v57 }
 0x2d5   : > { %vm974_vm13 = vcmp.eq.s32.totalorder %v1918_v61, %v950_v5  ;;  %1029 = vadd.xlane.f32.xlu0 %v1004_v41  ;;  %v1682_v41 = vld [vmem:[%s1728_s15 + $0x78] sm:$0xff] }
 0x2d6   : > { %v990_v23 = vsel %vm974_vm13, %v2405_v45, 0.0  ;;  %v2635_v16 = vadd.s32 4294967040, %v1682_v41 }
 0x2d7   : > { %v1006_v24 = vadd.f32 %v990_v23, %v910_v53  ;;  %1086 = vperm.xlu1 %1660, %v2568_v7  }
 0x2d8   : > { %v956_v49 = vpop.permute.xlu1 %955 }
 0x2d9   : > { %vm976_vm14 = vcmp.eq.s32.totalorder %v1918_v61, %v956_v49  ;;  %1033 = vadd.xlane.f32.xlu0 %v1006_v24 }
 0x2da   : > { %v992_v34 = vsel %vm976_vm14, %v2405_v45, 0.0 }
 0x2db   : > { %v1008_v9 = vadd.f32 %v992_v34, %v912_v2  ;;  %1089 = vperm.xlu1 %1660, %v2579_v28  }
 0x2dc   : > { %v962_v32 = vpop.permute.xlu1 %961 }
 0x2dd   : > { %vm978_vm15 = vcmp.eq.s32.totalorder %v1918_v61, %v962_v32  ;;  %1037 = vadd.xlane.f32.xlu0 %v1008_v9 }
 0x2de   : > { %v994_v25 = vsel %vm978_vm15, %v2405_v45, 0.0  ;;  %v2603_v45 = vadd.s32 4294967040, %v1674_v37 }
 0x2df   : > { %v1010_v62 = vadd.f32 %v994_v25, %v914_v0  ;;  %1092 = vperm.xlu1 %1660, %v2588_v38  }
 0x2e1   : > { %1041 = vadd.xlane.f32.xlu0 %v1010_v62  ;;  %v2735_v62 = vld [vmem:[%s3058_s1 + $0x2] ss:$0 sm:$0xff] }
 0x2e3   : > { %1095 = vperm.xlu1 %1660, %v2595_v36  }
 0x2e7   : > { %1098 = vperm.xlu1 %1660, %v2599_v4  }
 0x2eb   : > { %1101 = vperm.xlu1 %1660, %v2603_v45  }
 0x2ef   : > { %1107 = vperm.xlu1 %1660, %v2607_v30  }
 0x2f3   : > { %1113 = vperm.xlu1 %1660, %v2611_v47  }
 0x2f7   : > { %1119 = vperm.xlu1 %1660, %v2615_v10   ;;  %1080 = vperm.xlu0 %1659, %v1615_v35  }
 0x2fb   : > { %1661 = vset.pattern.permute.xlu1 %v3090_v17  ;;  %1104 = vperm.xlu0 %1659, %v2620_v11  }
 0x2fc   : > { %1179 = vperm.xlu1 %1661, %v2540_v6  }
 0x2ff   : > { %1110 = vperm.xlu0 %1659, %v2625_v63  }
 0x300   : > { %1185 = vperm.xlu1 %1661, %v2554_v12  }
 0x303   : > { %1116 = vperm.xlu0 %1659, %v2630_v22  }
 0x304   : > { %1188 = vperm.xlu1 %1661, %v2568_v7  }
 0x307   : > { %1122 = vperm.xlu0 %1659, %v2635_v16  }
 0x308   : > { %1194 = vperm.xlu1 %1661, %v2588_v38  }
 0x30b   : > { %1662 = vset.pattern.permute.xlu0 %v3090_v17 }
 0x30c   : > { %1200 = vperm.xlu1 %1661, %v2599_v4   ;;  %1182 = vperm.xlu0 %1662, %v1615_v35  }
 0x310   : > { %1206 = vperm.xlu1 %1661, %v2620_v11   ;;  %1191 = vperm.xlu0 %1662, %v2579_v28  }
 0x314   : > { %1212 = vperm.xlu1 %1661, %v2625_v63   ;;  %1197 = vperm.xlu0 %1662, %v2595_v36  }
 0x318   : > { %1218 = vperm.xlu1 %1661, %v2630_v22   ;;  %1203 = vperm.xlu0 %1662, %v2603_v45  }
 0x31c   : > { %1224 = vperm.xlu1 %1661, %v2635_v16   ;;  %1209 = vperm.xlu0 %1662, %v2607_v30  }
 0x320   : > { %1664 = vset.pattern.permute.xlu1 %v3078_v20  ;;  %1215 = vperm.xlu0 %1662, %v2611_v47  }
 0x321   : > { %1278 = vperm.xlu1 %1664, %v1615_v35  }
 0x324   : > { %1221 = vperm.xlu0 %1662, %v2615_v10  }
 0x325   : > { %1281 = vperm.xlu1 %1664, %v2554_v12  }
 0x328   : > { %1663 = vset.pattern.permute.xlu0 %v3078_v20 }
 0x329   : > { %1287 = vperm.xlu1 %1664, %v2579_v28   ;;  %1275 = vperm.xlu0 %1663, %v2540_v6  }
 0x32d   : > { %1293 = vperm.xlu1 %1664, %v2595_v36   ;;  %1284 = vperm.xlu0 %1663, %v2568_v7  }
 0x32f   : > { %v2661_v17 = vpop.xlane.xlu1 %1013 }
 0x331   : > { %1299 = vperm.xlu1 %1664, %v2603_v45   ;;  %1290 = vperm.xlu0 %1663, %v2588_v38  }
 0x335   : > { %1305 = vperm.xlu1 %1664, %v2607_v30   ;;  %1296 = vperm.xlu0 %1663, %v2599_v4  }
 0x337   : > { %v2665_v14 = vpop.xlane.xlu1 %1019 }
 0x339   : > { %1311 = vperm.xlu1 %1664, %v2611_v47   ;;  %1302 = vperm.xlu0 %1663, %v2620_v11  }
 0x33b   : > { %v2669_v20 = vpop.xlane.xlu1 %1023 }
 0x33d   : > { %1317 = vperm.xlu1 %1664, %v2615_v10   ;;  %1308 = vperm.xlu0 %1663, %v2625_v63  }
 0x33f   : > { %v2673_v5 = vpop.xlane.xlu1 %1027 }
 0x341   : > { %1665 = vset.pattern.permute.xlu1 %v3082_v54  ;;  %1314 = vperm.xlu0 %1663, %v2630_v22  }
 0x342   : > { %1371 = vperm.xlu1 %1665, %v2540_v6  }
 0x343   : > { %v2678_v52 = vpop.xlane.xlu1 %1031 }
 0x344   : > { %3094 = vst [vmem:[#allocation8_spill] sm:$0xff] %v2678_v52 }
 0x345   : > { %1320 = vperm.xlu0 %1663, %v2635_v16  }
 0x346   : > { %1377 = vperm.xlu1 %1665, %v2554_v12  }
 0x347   : > { %v2682_v53 = vpop.xlane.xlu1 %1035 }
 0x348   : > { %3095 = vst [vmem:[#allocation9_spill] sm:$0xff] %v2682_v53 }
 0x349   : > { %1666 = vset.pattern.permute.xlu0 %v3082_v54 }
 0x34a   : > { %1380 = vperm.xlu1 %1665, %v2568_v7   ;;  %1374 = vperm.xlu0 %1666, %v1615_v35  }
 0x34b   : > { %v2686_v21 = vpop.xlane.xlu1 %1039 }
 0x34c   : > { %3096 = vst [vmem:[#allocation10_spill] sm:$0xff] %v2686_v21 }
 0x34e   : > { %1386 = vperm.xlu1 %1665, %v2588_v38   ;;  %v2689_v27 = vpop.xlane.xlu0 %1011  ;;  %1383 = vperm.xlu0 %1666, %v2579_v28  }
 0x34f   : > { %v1078_v6 = vpop.permute.xlu1 %1077 }
 0x350   : > { %vm1124_vm1 = vcmp.eq.s32.totalorder %v1918_v61, %v1078_v6 }
 0x351   : > { %v1146_v43 = vsel %vm1124_vm1, %v2735_v62, 0.0 }
 0x352   : > { %1392 = vperm.xlu1 %1665, %v2599_v4   ;;  %v2693_v23 = vpop.xlane.xlu0 %1015  ;;  %1389 = vperm.xlu0 %1666, %v2595_v36  }
 0x353   : > { %v1084_v12 = vpop.permute.xlu1 %1083 }
 0x354   : > { %vm1126_vm0 = vcmp.eq.s32.totalorder %v1918_v61, %v1084_v12 }
 0x356   : > { %1398 = vperm.xlu1 %1665, %v2620_v11   ;;  %v2697_v54 = vpop.xlane.xlu0 %1017  ;;  %1395 = vperm.xlu0 %1666, %v2603_v45  }
 0x357   : > { %v1087_v7 = vpop.permute.xlu1 %1086 }
 0x358   : > { %vm1127_vm4 = vcmp.eq.s32.totalorder %v1918_v61, %v1087_v7 }
 0x359   : > { %v1149_v3 = vsel %vm1127_vm4, %v2735_v62, 0.0 }
 0x35a   : > { %1404 = vperm.xlu1 %1665, %v2625_v63   ;;  %v2701_v24 = vpop.xlane.xlu0 %1021  ;;  %1401 = vperm.xlu0 %1666, %v2607_v30   ;;  %v1148_v30 = vsel %vm1126_vm0, %v2735_v62, 0.0 }
 0x35b   : > { %v2704_v29 = vpop.permute.xlu1 %1089 }
 0x35c   : > { %vm1128_vm4 = vcmp.eq.s32.totalorder %v1918_v61, %v2704_v29 }
 0x35e   : > { %1410 = vperm.xlu1 %1665, %v2630_v22   ;;  %v2707_v28 = vpop.xlane.xlu0 %1025  ;;  %1407 = vperm.xlu0 %1666, %v2611_v47  }
 0x35f   : > { %v1093_v46 = vpop.permute.xlu1 %1092 }
 0x360   : > { %vm1129_vm7 = vcmp.eq.s32.totalorder %v1918_v61, %v1093_v46 }
 0x361   : > { %v1151_v63 = vsel %vm1129_vm7, %v2735_v62, 0.0 }
 0x362   : > { %1416 = vperm.xlu1 %1665, %v2635_v16   ;;  %v2711_v49 = vpop.xlane.xlu0 %1029  ;;  %1413 = vperm.xlu0 %1666, %v2615_v10  }
 0x363   : > { %3097 = vst [vmem:[#allocation11_spill] sm:$0xff] %v2711_v49  ;;  %v2714_v1 = vpop.permute.xlu1 %1095 }
 0x366   : > { %v2716_v2 = vpop.xlane.xlu0 %1033 }
 0x367   : > { %3098 = vst [vmem:[#allocation12_spill] sm:$0xff] %v2716_v2  ;;  %v1099_v34 = vpop.permute.xlu1 %1098 }
 0x368   : > { %vm1131_vm8 = vcmp.eq.s32.totalorder %v1918_v61, %v1099_v34 }
 0x369   : > { %v1153_v6 = vsel %vm1131_vm8, %v2735_v62, 0.0 }
 0x36a   : > { %v2720_v51 = vpop.xlane.xlu0 %1037 }
 0x36b   : > { %v2718_v9 = vpop.permute.xlu1 %1101  ;;  %3099 = vst [vmem:[#allocation13_spill] sm:$0xff] %v2720_v51 }
 0x36e   : > { %v2724_v8 = vpop.xlane.xlu0 %1041 }
 0x36f   : > { %v2722_v38 = vpop.permute.xlu1 %1107  ;;  %3100 = vst [vmem:[#allocation14_spill] sm:$0xff] %v2724_v8 }
 0x373   : > { %v2726_v32 = vpop.permute.xlu1 %1113 }
 0x376   : > { %v2728_v0 = vpop.permute.xlu0 %1080 }
 0x377   : > { %v2730_v25 = vpop.permute.xlu1 %1119  ;;  %vm1125_vm7 = vcmp.eq.s32.totalorder %v1918_v61, %v2728_v0  ;;  %v1150_v0 = vsel %vm1128_vm4, %v2735_v62, 0.0 }
 0x37a   : > { %v1105_v59 = vpop.permute.xlu0 %1104 }
 0x37b   : > { %v1180_v36 = vpop.permute.xlu1 %1179  ;;  %vm1133_vm10 = vcmp.eq.s32.totalorder %v1918_v61, %v1105_v59 }
 0x37c   : > { %vm1226_vm2 = vcmp.eq.s32.totalorder %v1918_v61, %v1180_v36  ;;  %v1155_v34 = vsel %vm1133_vm10, %v2735_v62, 0.0 }
 0x37d   : > { %v1242_v4 = vsel %vm1226_vm2, %v2735_v62, 0.0 }
 0x37e   : > { %v2742_v37 = vadd.f32 %v1242_v4, %v1146_v43  ;;  %v1111_v45 = vpop.permute.xlu0 %1110 }
 0x37f   : > { %v1186_v56 = vpop.permute.xlu1 %1185  ;;  %vm1135_vm13 = vcmp.eq.s32.totalorder %v1918_v61, %v1111_v45 }
 0x380   : > { %vm1228_vm3 = vcmp.eq.s32.totalorder %v1918_v61, %v1186_v56  ;;  %v1157_v59 = vsel %vm1135_vm13, %v2735_v62, 0.0 }
 0x381   : > { %v1244_v55 = vsel %vm1228_vm3, %v2735_v62, 0.0 }
 0x382   : > { %v2748_v47 = vadd.f32 %v1244_v55, %v1148_v30  ;;  %v1117_v31 = vpop.permute.xlu0 %1116 }
 0x383   : > { %v1189_v10 = vpop.permute.xlu1 %1188  ;;  %vm1137_vm14 = vcmp.eq.s32.totalorder %v1918_v61, %v1117_v31 }
 0x384   : > { %vm1229_vm5 = vcmp.eq.s32.totalorder %v1918_v61, %v1189_v10  ;;  %v1159_v45 = vsel %vm1137_vm14, %v2735_v62, 0.0 }
 0x385   : > { %v1245_v35 = vsel %vm1229_vm5, %v2735_v62, 0.0 }
 0x386   : > { %v2754_v58 = vadd.f32 %v1245_v35, %v1149_v3  ;;  %v1123_v11 = vpop.permute.xlu0 %1122 }
 0x387   : > { %v1195_v57 = vpop.permute.xlu1 %1194  ;;  %vm1139_vm1 = vcmp.eq.s32.totalorder %v1918_v61, %v1123_v11 }
 0x388   : > { %vm1231_vm6 = vcmp.eq.s32.totalorder %v1918_v61, %v1195_v57  ;;  %v1161_v31 = vsel %vm1139_vm1, %v2735_v62, 0.0 }
 0x389   : > { %v1247_v13 = vsel %vm1231_vm6, %v2735_v62, 0.0 }
 0x38a   : > { %v2760_v22 = vadd.f32 %v1247_v13, %v1151_v63 }
 0x38b   : > { %v2762_v41 = vpop.permute.xlu0 %1182  ;;  %v1201_v16 = vpop.permute.xlu1 %1200 }
 0x38c   : > { %vm1233_vm9 = vcmp.eq.s32.totalorder %v1918_v61, %v1201_v16  ;;  %vm1227_vm5 = vcmp.eq.s32.totalorder %v1918_v61, %v2762_v41 }
 0x38d   : > { %v1249_v12 = vsel %vm1233_vm9, %v2735_v62, 0.0  ;;  %v1243_v52 = vsel %vm1227_vm5, %v2735_v62, 0.0 }
 0x38e   : > { %v2768_v7 = vadd.f32 %v1249_v12, %v1153_v6 }
 0x38f   : > { %v2770_v46 = vpop.permute.xlu0 %1191  ;;  %v1207_v36 = vpop.permute.xlu1 %1206 }
 0x390   : > { %vm1235_vm12 = vcmp.eq.s32.totalorder %v1918_v61, %v1207_v36  ;;  %vm1230_vm6 = vcmp.eq.s32.totalorder %v1918_v61, %v2770_v46 }
 0x391   : > { %v1251_v43 = vsel %vm1235_vm12, %v2735_v62, 0.0  ;;  %vm1130_vm12 = vcmp.eq.s32.totalorder %v1918_v61, %v2714_v1 }
 0x392   : > { %v2776_v4 = vadd.f32 %v1251_v43, %v1155_v34 }
 0x393   : > { %v2778_v56 = vpop.permute.xlu0 %1197  ;;  %v1213_v30 = vpop.permute.xlu1 %1212 }
 0x394   : > { %vm1237_vm11 = vcmp.eq.s32.totalorder %v1918_v61, %v1213_v30  ;;  %vm1232_vm13 = vcmp.eq.s32.totalorder %v1918_v61, %v2778_v56 }
 0x395   : > { %v1253_v55 = vsel %vm1237_vm11, %v2735_v62, 0.0 }
 0x396   : > { %v2784_v10 = vadd.f32 %v1253_v55, %v1157_v59 }
 0x397   : > { %v2786_v3 = vpop.permute.xlu0 %1203  ;;  %v1219_v35 = vpop.permute.xlu1 %1218 }
 0x398   : > { %vm1239_vm15 = vcmp.eq.s32.totalorder %v1918_v61, %v1219_v35 }
 0x399   : > { %v1255_v57 = vsel %vm1239_vm15, %v2735_v62, 0.0  ;;  %vm1132_vm15 = vcmp.eq.s32.totalorder %v1918_v61, %v2718_v9 }
 0x39a   : > { %v2792_v63 = vadd.f32 %v1255_v57, %v1159_v45 }
 0x39b   : > { %v2794_v13 = vpop.permute.xlu0 %1209  ;;  %v1225_v16 = vpop.permute.xlu1 %1224 }
 0x39c   : > { %vm1241_vm2 = vcmp.eq.s32.totalorder %v1918_v61, %v1225_v16 }
 0x39d   : > { %v1257_v6 = vsel %vm1241_vm2, %v2735_v62, 0.0  ;;  %vm1234_vm2 = vcmp.eq.s32.totalorder %v1918_v61, %v2786_v3 }
 0x39e   : > { %v2799_v12 = vadd.f32 %v1257_v6, %v1161_v31 }
 0x39f   : > { %v2801_v36 = vpop.permute.xlu0 %1215 }
 0x3a0   : > { %v1279_v34 = vpop.permute.xlu1 %1278 }
 0x3a1   : > { %vm1323_vm9 = vcmp.eq.s32.totalorder %v1918_v61, %v1279_v34 }
 0x3a2   : > { %v1339_v46 = vsel %vm1323_vm9, %v2735_v62, 0.0 }
 0x3a3   : > { %v2803_v43 = vpop.permute.xlu0 %1221 }
 0x3a4   : > { %v1282_v30 = vpop.permute.xlu1 %1281 }
 0x3a5   : > { %vm1324_vm3 = vcmp.eq.s32.totalorder %v1918_v61, %v1282_v30 }
 0x3a6   : > { %v1340_v30 = vsel %vm1324_vm3, %v2735_v62, 0.0 }
 0x3a7   : > { %v1356_v34 = vadd.f32 %v1340_v30, %v2748_v47  ;;  %v1248_v47 = vsel %vm1232_vm13, %v2735_v62, 0.0  ;;  %vm1238_vm13 = vcmp.eq.s32.totalorder %v1918_v61, %v2801_v36 }
 0x3a8   : > { %v1276_v11 = vpop.permute.xlu0 %1275  ;;  %v1288_v59 = vpop.permute.xlu1 %1287 }
 0x3a9   : > { %vm1322_vm0 = vcmp.eq.s32.totalorder %v1918_v61, %v1276_v11  ;;  %vm1326_vm14 = vcmp.eq.s32.totalorder %v1918_v61, %v1288_v59 }
 0x3aa   : > { %v1338_v53 = vsel %vm1322_vm0, %v2735_v62, 0.0 }
 0x3ab   : > { %v1354_v11 = vadd.f32 %v1338_v53, %v2742_v37  ;;  %v1246_v53 = vsel %vm1230_vm6, %v2735_v62, 0.0 }
 0x3ac   : > { %v1285_v55 = vpop.permute.xlu0 %1284  ;;  %v2805_v35 = vpop.permute.xlu1 %1293  ;;  %v1262_v49 = vadd.f32 %v1246_v53, %v1150_v0 }
 0x3ad   : > { %vm1325_vm10 = vcmp.eq.s32.totalorder %v1918_v61, %v1285_v55  ;;  %vm1328_vm4 = vcmp.eq.s32.totalorder %v1918_v61, %v2805_v35  ;;  %v1250_v35 = vsel %vm1234_vm2, %v2735_v62, 0.0  ;;  %vm1136_vm2 = vcmp.eq.s32.totalorder %v1918_v61, %v2726_v32 }
 0x3ae   : > { %v1341_v1 = vsel %vm1325_vm10, %v2735_v62, 0.0  ;;  %v1344_v9 = vsel %vm1328_vm4, %v2735_v62, 0.0  ;;  %vm1134_vm10 = vcmp.eq.s32.totalorder %v1918_v61, %v2722_v38 }
 0x3b0   : > { %v1291_v45 = vpop.permute.xlu0 %1290  ;;  %v2807_v57 = vpop.permute.xlu1 %1299 }
 0x3b1   : > { %vm1327_vm1 = vcmp.eq.s32.totalorder %v1918_v61, %v1291_v45  ;;  %vm1330_vm9 = vcmp.eq.s32.totalorder %v1918_v61, %v2807_v57 }
 0x3b2   : > { %v1343_v45 = vsel %vm1327_vm1, %v2735_v62, 0.0 }
 0x3b4   : > { %v2809_v16 = vpop.permute.xlu0 %1296  ;;  %v2811_v8 = vpop.permute.xlu1 %1305 }
 0x3b5   : > { %vm1329_vm5 = vcmp.eq.s32.totalorder %v1918_v61, %v2809_v16 }
 0x3b8   : > { %v2813_v31 = vpop.permute.xlu0 %1302  ;;  %v2815_v6 = vpop.permute.xlu1 %1311 }
 0x3b9   : > { %vm1334_vm4 = vcmp.eq.s32.totalorder %v1918_v61, %v2815_v6 }
 0x3bc   : > { %v2818_v21 = vpop.permute.xlu0 %1308  ;;  %v2820_v51 = vpop.permute.xlu1 %1317 }
 0x3bd   : > { %vm1333_vm1 = vcmp.eq.s32.totalorder %v1918_v61, %v2818_v21 }
 0x3be   : > { %v1349_v36 = vsel %vm1333_vm1, %v2735_v62, 0.0  ;;  %vm1514_vm1 = vcmask 7168  }
 0x3bf   : > { %v1365_v32 = vadd.f32 %v1349_v36, %v2784_v10 }
 0x3c0   : > { %v2824_v2 = vpop.permute.xlu0 %1314 }
 0x3c1   : > { %v1372_v19 = vpop.permute.xlu1 %1371 }
 0x3c2   : > { %vm1418_vm8 = vcmp.eq.s32.totalorder %v1918_v61, %v1372_v19  ;;  %v1147_v19 = vsel %vm1125_vm7, %v2735_v62, 0.0  ;;  %vm1236_vm7 = vcmp.eq.s32.totalorder %v1918_v61, %v2794_v13 }
 0x3c3   : > { %v1434_v29 = vsel %vm1418_vm8, %v2735_v62, 0.0  ;;  %v1259_v55 = vadd.f32 %v1243_v52, %v1147_v19  ;;  %v1357_v19 = vadd.f32 %v1341_v1, %v2754_v58  ;;  %v1252_v57 = vsel %vm1236_vm7, %v2735_v62, 0.0 }
 0x3c4   : > { %v1450_v41 = vadd.f32 %v1434_v29, %v1354_v11  ;;  %v2841_v26 = vpop.permute.xlu0 %1320  ;;  %v1152_v29 = vsel %vm1130_vm12, %v2735_v62, 0.0  ;;  %vm1331_vm12 = vcmp.eq.s32.totalorder %v1918_v61, %v2813_v31  ;;  %v1254_v31 = vsel %vm1238_vm13, %v2735_v62, 0.0 }
 0x3c5   : > { %v1378_v37 = vpop.permute.xlu1 %1377  ;;  %v1355_v52 = vadd.f32 %v1339_v46, %v1259_v55  ;;  %v1347_v13 = vsel %vm1331_vm12, %v2735_v62, 0.0  ;;  %vm1138_vm7 = vcmp.eq.s32.totalorder %v1918_v61, %v2730_v25  ;;  %vm1337_vm12 = vcmp.eq.s32.totalorder %v1918_v61, %v2841_v26 }
 0x3c6   : > { %vm1420_vm11 = vcmp.eq.s32.totalorder %v1918_v61, %v1378_v37  ;;  %1466 = vadd.xlane.f32.xlu0 %v1450_v41  ;;  %v1342_v41 = vsel %vm1326_vm14, %v2735_v62, 0.0  ;;  %v1154_v37 = vsel %vm1132_vm15, %v2735_v62, 0.0  ;;  %vm1332_vm15 = vcmp.eq.s32.totalorder %v1918_v61, %v2811_v8 }
 0x3c7   : > { %v1436_v11 = vsel %vm1420_vm11, %v2735_v62, 0.0  ;;  %v1358_v55 = vadd.f32 %v1342_v41, %v1262_v49  ;;  %v1345_v49 = vsel %vm1329_vm5, %v2735_v62, 0.0  ;;  %v1346_v41 = vsel %vm1330_vm9, %v2735_v62, 0.0 }
 0x3c8   : > { %v1452_v56 = vadd.f32 %v1436_v11, %v1356_v34  ;;  %v1264_v34 = vadd.f32 %v1248_v47, %v1152_v29  ;;  %v1348_v38 = vsel %vm1332_vm15, %v2735_v62, 0.0  ;;  %vm1335_vm5 = vcmp.eq.s32.totalorder %v1918_v61, %v2824_v2 }
 0x3c9   : > { %v1375_v59 = vpop.permute.xlu0 %1374  ;;  %v1381_v30 = vpop.permute.xlu1 %1380 }
 0x3ca   : > { %vm1419_vm0 = vcmp.eq.s32.totalorder %v1918_v61, %v1375_v59  ;;  %vm1421_vm3 = vcmp.eq.s32.totalorder %v1918_v61, %v1381_v30  ;;  %1470 = vadd.xlane.f32.xlu0 %v1452_v56  ;;  %v1359_v56 = vadd.f32 %v1343_v45, %v2760_v22  ;;  %v1360_v16 = vadd.f32 %v1344_v9, %v1264_v34 }
 0x3cb   : > { %v1435_v0 = vsel %vm1419_vm0, %v2735_v62, 0.0  ;;  %v1437_v53 = vsel %vm1421_vm3, %v2735_v62, 0.0 }
 0x3cc   : > { %v1451_v58 = vadd.f32 %v1435_v0, %v1355_v52  ;;  %v1453_v46 = vadd.f32 %v1437_v53, %v1357_v19  ;;  %v1266_v52 = vadd.f32 %v1250_v35, %v1154_v37  ;;  %v1361_v19 = vadd.f32 %v1345_v49, %v2768_v7 }
 0x3cd   : > { %v1384_v1 = vpop.permute.xlu0 %1383  ;;  %v1387_v11 = vpop.permute.xlu1 %1386  ;;  %v1156_v7 = vsel %vm1134_vm10, %v2735_v62, 0.0  ;;  %v1363_v35 = vadd.f32 %v1347_v13, %v2776_v4  ;;  %v1158_v4 = vsel %vm1136_vm2, %v2735_v62, 0.0  ;;  %vm1336_vm10 = vcmp.eq.s32.totalorder %v1918_v61, %v2820_v51 }
 0x3ce   : > { %vm1422_vm6 = vcmp.eq.s32.totalorder %v1918_v61, %v1384_v1  ;;  %vm1423_vm8 = vcmp.eq.s32.totalorder %v1918_v61, %v1387_v11  ;;  %1468 = vadd.xlane.f32.xlu1 %v1451_v58  ;;  %1472 = vadd.xlane.f32.xlu0 %v1453_v46  ;;  %v1268_v8 = vadd.f32 %v1252_v57, %v1156_v7  ;;  %v1160_v51 = vsel %vm1138_vm7, %v2735_v62, 0.0 }
 0x3cf   : > { %v1438_v3 = vsel %vm1422_vm6, %v2735_v62, 0.0  ;;  %v1439_v29 = vsel %vm1423_vm8, %v2735_v62, 0.0  ;;  %v1362_v58 = vadd.f32 %v1346_v41, %v1266_v52  ;;  %v1270_v6 = vadd.f32 %v1254_v31, %v1158_v4 }
 0x3d0   : > { %v1454_v22 = vadd.f32 %v1438_v3, %v1358_v55  ;;  %v1455_v47 = vadd.f32 %v1439_v29, %v1359_v56  ;;  %vm1240_vm6 = vcmp.eq.s32.totalorder %v1918_v61, %v2803_v43  ;;  %v1364_v21 = vadd.f32 %v1348_v38, %v1268_v8 }
 0x3d1   : > { %v1390_v59 = vpop.permute.xlu0 %1389  ;;  %v1393_v30 = vpop.permute.xlu1 %1392  ;;  %v1350_v3 = vsel %vm1334_vm4, %v2735_v62, 0.0  ;;  %v1351_v43 = vsel %vm1335_vm5, %v2735_v62, 0.0  ;;  %v1256_v10 = vsel %vm1240_vm6, %v2735_v62, 0.0  ;;  %v1353_v41 = vsel %vm1337_vm12, %v2735_v62, 0.0 }
 0x3d2   : > { %vm1424_vm11 = vcmp.eq.s32.totalorder %v1918_v61, %v1390_v59  ;;  %vm1425_vm14 = vcmp.eq.s32.totalorder %v1918_v61, %v1393_v30  ;;  %1474 = vadd.xlane.f32.xlu1 %v1454_v22  ;;  %1476 = vadd.xlane.f32.xlu0 %v1455_v47  ;;  %v1366_v57 = vadd.f32 %v1350_v3, %v1270_v6  ;;  %v1352_v59 = vsel %vm1336_vm10, %v2735_v62, 0.0  ;;  %v3101_v6 = vld [vmem:[#allocation11_spill] sm:$0xff] }
 0x3d3   : > { %v1440_v45 = vsel %vm1424_vm11, %v2735_v62, 0.0  ;;  %v1441_v0 = vsel %vm1425_vm14, %v2735_v62, 0.0  ;;  %v1367_v30 = vadd.f32 %v1351_v43, %v2792_v63  ;;  %v1272_v26 = vadd.f32 %v1256_v10, %v1160_v51  ;;  %v3105_v43 = vld [vmem:[#allocation12_spill] sm:$0xff]  ;;  %v3108_v51 = vld [vmem:[#allocation7_spill] sm:$0xff] }
 0x3d4   : > { %v1456_v53 = vadd.f32 %v1440_v45, %v1360_v16  ;;  %v1457_v37 = vadd.f32 %v1441_v0, %v1361_v19  ;;  %v1369_v63 = vadd.f32 %v1353_v41, %v2799_v12  ;;  %v1045_v12 = vadd.f32 %v2693_v23, %v2255_v18  ;;  %v3106_v10 = vld [vmem:[#allocation4_spill] sm:$0xff]  ;;  %v3110_v41 = vld [vmem:[#allocation5_spill] sm:$0xff] }
 0x3d5   : > { %v1396_v46 = vpop.permute.xlu0 %1395  ;;  %v1399_v34 = vpop.permute.xlu1 %1398  ;;  %v1368_v0 = vadd.f32 %v1352_v59, %v1272_v26  ;;  %v1046_v38 = vadd.f32 %v2697_v54, %v2309_v44  ;;  %v1047_v18 = vadd.f32 %v2665_v14, %v2258_v60  ;;  %v1048_v23 = vadd.f32 %v2701_v24, %v2313_v48 }
 0x3d6   : > { %vm1426_vm0 = vcmp.eq.s32.totalorder %v1918_v61, %v1396_v46  ;;  %vm1427_vm3 = vcmp.eq.s32.totalorder %v1918_v61, %v1399_v34  ;;  %1478 = vadd.xlane.f32.xlu1 %v1456_v53  ;;  %1480 = vadd.xlane.f32.xlu0 %v1457_v37  ;;  %v1043_v46 = vadd.f32 %v2689_v27, %v2307_v39 }
 0x3d7   : > { %v1442_v55 = vsel %vm1426_vm0, %v2735_v62, 0.0  ;;  %v1443_v1 = vsel %vm1427_vm3, %v2735_v62, 0.0  ;;  %v1044_v27 = vadd.f32 %v2661_v17, %v2252_v15  ;;  %v1049_v4 = vadd.f32 %v2669_v20, %v2261_v33 }
 0x3d8   : > { %v1458_v11 = vadd.f32 %v1442_v55, %v1362_v58  ;;  %v1459_v9 = vadd.f32 %v1443_v1, %v1363_v35 }
 0x3d9   : > { %v1402_v56 = vpop.permute.xlu0 %1401  ;;  %v1405_v49 = vpop.permute.xlu1 %1404 }
 0x3da   : > { %vm1428_vm8 = vcmp.eq.s32.totalorder %v1918_v61, %v1402_v56  ;;  %vm1429_vm9 = vcmp.eq.s32.totalorder %v1918_v61, %v1405_v49  ;;  %1482 = vadd.xlane.f32.xlu1 %v1458_v11  ;;  %1484 = vadd.xlane.f32.xlu0 %v1459_v9  ;;  %v1050_v11 = vadd.f32 %v2707_v28, %v2318_v50  ;;  %v3102_v56 = vld [vmem:[#allocation3_spill] sm:$0xff]  ;;  %v3103_v49 = vld [vmem:[#allocation8_spill] sm:$0xff] }
 0x3db   : > { %v1444_v29 = vsel %vm1428_vm8, %v2735_v62, 0.0  ;;  %v1445_v22 = vsel %vm1429_vm9, %v2735_v62, 0.0  ;;  %v1051_v9 = vadd.f32 %v2673_v5, %v2264_v42  ;;  %v1053_v3 = vadd.f32 %v3103_v49, %v3102_v56 }
 0x3dc   : > { %v1460_v47 = vadd.f32 %v1444_v29, %v1364_v21  ;;  %v1461_v52 = vadd.f32 %v1445_v22, %v1365_v32  ;;  %v1052_v21 = vadd.f32 %v3101_v6, %v2324_v40  ;;  %v3104_v32 = vld [vmem:[#allocation6_spill] sm:$0xff] }
 0x3dd   : > { %v1408_v16 = vpop.permute.xlu0 %1407  ;;  %v1411_v2 = vpop.permute.xlu1 %1410  ;;  %v1054_v29 = vadd.f32 %v3105_v43, %v3104_v32 }
 0x3de   : > { %vm1430_vm13 = vcmp.eq.s32.totalorder %v1918_v61, %v1408_v16  ;;  %vm1431_vm11 = vcmp.eq.s32.totalorder %v1918_v61, %v1411_v2  ;;  %1486 = vadd.xlane.f32.xlu1 %v1460_v47  ;;  %1488 = vadd.xlane.f32.xlu0 %v1461_v52  ;;  %v3107_v47 = vld [vmem:[#allocation9_spill] sm:$0xff] }
 0x3df   : > { %v1446_v19 = vsel %vm1430_vm13, %v2735_v62, 0.0  ;;  %v1447_v25 = vsel %vm1431_vm11, %v2735_v62, 0.0  ;;  %v1055_v52 = vadd.f32 %v3107_v47, %v3106_v10 }
 0x3e0   : > { %v1462_v13 = vadd.f32 %v1446_v19, %v1366_v57  ;;  %v1463_v45 = vadd.f32 %v1447_v25, %v1367_v30  ;;  %v3109_v57 = vld [vmem:[#allocation13_spill] sm:$0xff]  ;;  %v3111_v19 = vld [vmem:[#allocation10_spill] sm:$0xff] }
 0x3e1   : > { %v1414_v7 = vpop.permute.xlu0 %1413  ;;  %v1417_v53 = vpop.permute.xlu1 %1416  ;;  %v1056_v16 = vadd.f32 %v3109_v57, %v3108_v51  ;;  %v1057_v25 = vadd.f32 %v3111_v19, %v3110_v41 }
 0x3e2   : > { %vm1432_vm14 = vcmp.eq.s32.totalorder %v1918_v61, %v1414_v7  ;;  %vm1433_vm15 = vcmp.eq.s32.totalorder %v1918_v61, %v1417_v53  ;;  %1490 = vadd.xlane.f32.xlu1 %v1462_v13  ;;  %1492 = vadd.xlane.f32.xlu0 %v1463_v45  ;;  %v3112_v13 = vld [vmem:[#allocation2_spill] sm:$0xff] }
 0x3e3   : > { %v1448_v37 = vsel %vm1432_vm14, %v2735_v62, 0.0  ;;  %v1449_v8 = vsel %vm1433_vm15, %v2735_v62, 0.0  ;;  %v3113_v45 = vld [vmem:[#allocation14_spill] sm:$0xff] }
 0x3e4   : > { %v1464_v31 = vadd.f32 %v1448_v37, %v1368_v0  ;;  %v1465_v58 = vadd.f32 %v1449_v8, %v1369_v63  ;;  %v1058_v0 = vadd.f32 %v3113_v45, %v3112_v13 }
 0x3e6   : > { %1494 = vadd.xlane.f32.xlu1 %v1464_v31  ;;  %1496 = vadd.xlane.f32.xlu0 %v1465_v58 }
 0x453   : > { %v1467_v61 = vpop.xlane.xlu0 %1466 }
 0x454   : > { %v1498_v62 = vadd.f32 %v1467_v61, %v1043_v46 }
 0x456   : > { %1515 = vst.msk [vmem:[%s2990_s24] sm:$0xff] %vm1514_vm1, %v1498_v62 }
 0x457   : > { %v1471_v34 = vpop.xlane.xlu0 %1470 }
 0x458   : > { %v1500_v39 = vadd.f32 %v1471_v34, %v1045_v12 }
 0x45a   : > { %1517 = vst.msk [vmem:[%s2990_s24 + $0x10] sm:$0xff] %vm1514_vm1, %v1500_v39 }
 0x45b   : > { %v1473_v35 = vpop.xlane.xlu0 %1472  ;;  %v1469_v36 = vpop.xlane.xlu1 %1468 }
 0x45c   : > { %v1501_v55 = vadd.f32 %v1473_v35, %v1046_v38  ;;  %v1499_v1 = vadd.f32 %v1469_v36, %v1044_v27 }
 0x45e   : > { %1518 = vst.msk [vmem:[%s2990_s24 + $0x18] sm:$0xff] %vm1514_vm1, %v1501_v55  ;;  %1516 = vst.msk [vmem:[%s2990_s24 + $0x8] sm:$0xff] %vm1514_vm1, %v1499_v1 }
 0x45f   : > { %v1477_v15 = vpop.xlane.xlu0 %1476  ;;  %v1475_v44 = vpop.xlane.xlu1 %1474 }
 0x460   : > { %v1503_v17 = vadd.f32 %v1477_v15, %v1048_v23  ;;  %v1502_v54 = vadd.f32 %v1475_v44, %v1047_v18 }
 0x462   : > { %1520 = vst.msk [vmem:[%s2990_s24 + $0x28] sm:$0xff] %vm1514_vm1, %v1503_v17  ;;  %1519 = vst.msk [vmem:[%s2990_s24 + $0x20] sm:$0xff] %vm1514_vm1, %v1502_v54 }
 0x463   : > { %v1481_v60 = vpop.xlane.xlu0 %1480  ;;  %v1479_v48 = vpop.xlane.xlu1 %1478 }
 0x464   : > { %v1505_v14 = vadd.f32 %v1481_v60, %v1050_v11  ;;  %v1504_v24 = vadd.f32 %v1479_v48, %v1049_v4 }
 0x466   : > { %1522 = vst.msk [vmem:[%s2990_s24 + $0x38] sm:$0xff] %vm1514_vm1, %v1505_v14  ;;  %1521 = vst.msk [vmem:[%s2990_s24 + $0x30] sm:$0xff] %vm1514_vm1, %v1504_v24 }
 0x467   : > { %v1485_v33 = vpop.xlane.xlu0 %1484  ;;  %v1483_v50 = vpop.xlane.xlu1 %1482 }
 0x468   : > { %v1507_v20 = vadd.f32 %v1485_v33, %v1052_v21  ;;  %v1506_v28 = vadd.f32 %v1483_v50, %v1051_v9 }
 0x46a   : > { %1524 = vst.msk [vmem:[%s2990_s24 + $0x48] sm:$0xff] %vm1514_vm1, %v1507_v20  ;;  %1523 = vst.msk [vmem:[%s2990_s24 + $0x40] sm:$0xff] %vm1514_vm1, %v1506_v28 }
 0x46b   : > { %v1489_v42 = vpop.xlane.xlu0 %1488  ;;  %v1487_v40 = vpop.xlane.xlu1 %1486 }
 0x46c   : > { %v1509_v5 = vadd.f32 %v1489_v42, %v1054_v29  ;;  %v1508_v22 = vadd.f32 %v1487_v40, %v1053_v3 }
 0x46e   : > { %1526 = vst.msk [vmem:[%s2990_s24 + $0x58] sm:$0xff] %vm1514_vm1, %v1509_v5  ;;  %1525 = vst.msk [vmem:[%s2990_s24 + $0x50] sm:$0xff] %vm1514_vm1, %v1508_v22 }
 0x46f   : > { %v1493_v2 = vpop.xlane.xlu0 %1492  ;;  %v1491_v59 = vpop.xlane.xlu1 %1490 }
 0x470   : > { %v1511_v30 = vadd.f32 %v1493_v2, %v1056_v16  ;;  %v1510_v26 = vadd.f32 %v1491_v59, %v1055_v52 }
 0x472   : > { %1528 = vst.msk [vmem:[%s2990_s24 + $0x68] sm:$0xff] %vm1514_vm1, %v1511_v30  ;;  %1527 = vst.msk [vmem:[%s2990_s24 + $0x60] sm:$0xff] %vm1514_vm1, %v1510_v26 }
 0x473   : > { %v1497_v7 = vpop.xlane.xlu0 %1496  ;;  %v1495_v53 = vpop.xlane.xlu1 %1494 }
 0x474   : > { %v1513_v63 = vadd.f32 %v1497_v7, %v1058_v0  ;;  %v1512_v37 = vadd.f32 %v1495_v53, %v1057_v25 }
 0x476   : > { %1530 = vst.msk [vmem:[%s2990_s24 + $0x78] sm:$0xff] %vm1514_vm1, %v1513_v63  ;;  %1529 = vst.msk [vmem:[%s2990_s24 + $0x70] sm:$0xff] %vm1514_vm1, %v1512_v37 }
 0x477 PF: > { %s12_s9 = sadd.s32 1, %s1689_s9  }
 0x478   : > { %p9_p4 = scmp.ge.s32.totalorder %s12_s9, 4  }
 0x47a   :  { %11 = sbr.rel (!%p9_p4) target bundleno = 1 (0x1), region = 58 }

</bundles_post_ra>
